<compile_context>
chip_gen: v7x
topology: tpu7x:2x2x1
jax: 0.10.0
libtpu: 0.0.40
codegen_flags: <defaults>
</compile_context>

<pallas_src>
import jax
import jax.numpy as jnp
from jax.experimental import pallas as pl
from jax.experimental.pallas import tpu as pltpu

N_P_COV = 1
N_PSI_COV = 2
H_DIM = 64
NYEARS = 20
NVIS = 2


def _round_up(x, m):
    return -(-x // m) * m


def _p_sigmoid_kernel(wpx_ref, base_ref, oxy_ref, p_ref):
    """p = sigmoid(base[year] + w_x * oxy), fully lane-dense 640-wide rows.

    Inputs are pre-halved so the tanh-form sigmoid needs no extra scaling:
      sigmoid(2*z) = 0.5 + 0.5*tanh(z),  z = base/2 + (w_x/2) * x.
    """
    half_logit = base_ref[...] + wpx_ref[0] * oxy_ref[...]      # (block_g, 640)
    p_ref[...] = 0.5 + 0.5 * jnp.tanh(half_logit)


def net1_forward(sxy, oxy, params, *, site_group=16, target_blocks=2,
                 max_block_groups=512):
    """sxy: (NYEARS, N_PSI_COV); oxy: (nsites, 1, NYEARS, NVIS).

    Returns (psi: (NYEARS, 1), p: (nsites, NYEARS, NVIS)) matching Net1.forward.
    """
    wh, bh, wpsi, bpsi, wp, bp = params
    nsites = oxy.shape[0]

    # ---- tiny per-year head (20x64) in plain JAX, per the perf review ----
    h = jax.nn.elu(sxy @ wh.T + bh)                      # (NYEARS, H_DIM)
    psi = jax.nn.sigmoid(h @ wpsi.T + bpsi)              # (NYEARS, 1)
    base = (h @ wp[:, :H_DIM].T + bp)[:, 0]              # (NYEARS,) per-year p-logit base
    wpx = wp[0, H_DIM]                                   # scalar obs-covariate weight

    # Pre-halve for the tanh-form sigmoid (tiny arrays only, not the big input).
    base_half = 0.5 * base
    wpx_half = (0.5 * wpx).reshape(1)                    # (1,) -> SMEM

    # ---- lane-dense, transpose-free layout for the big arrays ----
    G = site_group                                       # sites packed per row
    width = G * NYEARS * NVIS                            # 16*40 = 640 = 5 full vregs
    # Per-row logit base: repeat each year over visits, tile over the G sites
    # of a row:  lane = site_in_group*40 + year*2 + visit.
    base_row = jnp.tile(jnp.repeat(base_half, NVIS), G).reshape(1, width)

    n_groups = pl.cdiv(nsites, G)
    block_g = min(_round_up(pl.cdiv(n_groups, target_blocks), 8), max_block_groups)
    n_groups_pad = _round_up(n_groups, block_g)
    s_pad = n_groups_pad * G

    oxy2 = oxy[:, 0, :, :].reshape(nsites, NYEARS * NVIS)     # contiguous (no copy)
    if s_pad != nsites:
        # One small pad op (skipped when nsites is already block-aligned).
        oxy2 = jnp.pad(oxy2, ((0, s_pad - nsites), (0, 0)))
    oxy_rows = oxy2.reshape(n_groups_pad, width)               # contiguous (no copy)

    n_elem = s_pad * NYEARS * NVIS
    cost = pl.CostEstimate(flops=4 * n_elem, transcendentals=n_elem,
                           bytes_accessed=2 * 4 * n_elem)

    p_rows = pl.pallas_call(
        _p_sigmoid_kernel,
        out_shape=jax.ShapeDtypeStruct((n_groups_pad, width), jnp.float32),
        grid=(n_groups_pad // block_g,),
        in_specs=[
            pl.BlockSpec(memory_space=pltpu.MemorySpace.SMEM),     # wpx_half scalar
            pl.BlockSpec((1, width), lambda i: (0, 0)),            # base row (bcast)
            pl.BlockSpec((block_g, width), lambda i: (i, 0)),      # oxy rows
        ],
        out_specs=pl.BlockSpec((block_g, width), lambda i: (i, 0)),
        compiler_params=pltpu.CompilerParams(
            dimension_semantics=("parallel",)),
        cost_estimate=cost,
    )(wpx_half, base_row, oxy_rows)

    # Contiguous reshape back to the module's (nsites, nyears, nvis) layout.
    p = p_rows.reshape(s_pad, NYEARS, NVIS)[:nsites]
    # TODO(synk): if downstream tolerates it, store oxy/p as bf16 in HBM to
    # halve the kernel's memory traffic (compute stays f32 in VMEM).
    return psi, p


if __name__ == "__main__":
    key = jax.random.PRNGKey(0)
    ks = jax.random.split(key, 8)

    nsites = 1000   # the module's simulation size (still small: ~160 KB / array)

    # inputs (Uniform(-1, 1), matching the simulation driver)
    sxy = jax.random.uniform(ks[0], (NYEARS, N_PSI_COV), jnp.float32, -1.0, 1.0)
    oxy = jax.random.uniform(ks[1], (nsites, 1, NYEARS, NVIS), jnp.float32, -1.0, 1.0)

    # deterministic PyTorch-Linear-style init: U(-1/sqrt(fan_in), 1/sqrt(fan_in))
    def lin_init(kw, kb, out_f, in_f):
        bound = 1.0 / (in_f ** 0.5)
        w = jax.random.uniform(kw, (out_f, in_f), jnp.float32, -bound, bound)
        b = jax.random.uniform(kb, (out_f,), jnp.float32, -bound, bound)
        return w, b

    wh, bh = lin_init(ks[2], ks[3], H_DIM, N_PSI_COV)        # to_h
    wpsi, bpsi = lin_init(ks[4], ks[5], 1, H_DIM)            # to_psi
    wp, bp = lin_init(ks[6], ks[7], 1, H_DIM + N_P_COV)      # to_p

    fwd = jax.jit(net1_forward)
    psi_out, p_out = fwd(sxy, oxy, (wh, bh, wpsi, bpsi, wp, bp))
    jax.block_until_ready((psi_out, p_out))

    # pure-JAX reference (same math as the PyTorch loops, vectorized)
    h_ref = jax.nn.elu(sxy @ wh.T + bh)
    psi_ref = jax.nn.sigmoid(h_ref @ wpsi.T + bpsi)
    base_ref = (h_ref @ wp[:, :H_DIM].T + bp)[:, 0]                        # (20,)
    p_ref = jax.nn.sigmoid(base_ref[None, :, None]
                           + wp[0, H_DIM] * oxy[:, 0, :, :])               # (nsites, 20, 2)

    assert psi_out.shape == (NYEARS, 1) and p_out.shape == (nsites, NYEARS, NVIS)
    assert jnp.allclose(psi_out, psi_ref, atol=1e-5), "psi mismatch"
    assert jnp.allclose(p_out, p_ref, atol=1e-5), "p mismatch"
    print("KERNEL_OK")
</pallas_src>

<mosaic_0001>
module attributes {stable_mosaic.version = 11 : i64} {
  func.func @_p_sigmoid_kernel(%arg0: i32, %arg1: memref<1xf32, #tpu.memory_space<smem>>, %arg2: memref<1x640xf32, #tpu.memory_space<vmem>>, %arg3: memref<32x640xf32, #tpu.memory_space<vmem>>, %arg4: memref<32x640xf32, #tpu.memory_space<vmem>>) attributes {dimension_semantics = [#tpu.dimension_semantics<parallel>], iteration_bounds = array<i64: 2>, scalar_prefetch = 0 : i64, scratch_operands = 0 : i64, tpu.core_type = #tpu.core_type<tc>, window_params = [{transform_indices = @transform_0, window_bounds = array<i64: 1>}, {pipeline_mode = #tpu.pipeline_mode<synchronous>, transform_indices = @transform_1, window_bounds = array<i64: 1, 640>}, {transform_indices = @transform_2, window_bounds = array<i64: 32, 640>}, {transform_indices = @transform_3, window_bounds = array<i64: 32, 640>}]} {
    %c0 = arith.constant 0 : index
    %c0_0 = arith.constant 0 : index
    %0 = vector.load %arg2[%c0, %c0_0] : memref<1x640xf32, #tpu.memory_space<vmem>>, vector<1x640xf32>
    %c0_1 = arith.constant 0 : index
    %1 = memref.load %arg1[%c0_1] : memref<1xf32, #tpu.memory_space<smem>>
    %c0_2 = arith.constant 0 : index
    %c0_3 = arith.constant 0 : index
    %2 = vector.load %arg3[%c0_2, %c0_3] : memref<32x640xf32, #tpu.memory_space<vmem>>, vector<32x640xf32>
    %3 = vector.broadcast %1 : f32 to vector<32x640xf32>
    %4 = arith.mulf %3, %2 : vector<32x640xf32>
    %5 = vector.broadcast %0 : vector<1x640xf32> to vector<32x640xf32>
    %6 = arith.addf %5, %4 : vector<32x640xf32>
    %7 = math.tanh %6 : vector<32x640xf32>
    %cst = arith.constant 5.000000e-01 : f32
    %8 = vector.broadcast %cst : f32 to vector<32x640xf32>
    %9 = arith.mulf %8, %7 : vector<32x640xf32>
    %cst_4 = arith.constant 5.000000e-01 : f32
    %10 = vector.broadcast %cst_4 : f32 to vector<32x640xf32>
    %11 = arith.addf %10, %9 : vector<32x640xf32>
    %c0_5 = arith.constant 0 : index
    %c0_6 = arith.constant 0 : index
    %12 = vector.load %arg4[%c0_5, %c0_6] : memref<32x640xf32, #tpu.memory_space<vmem>>, vector<32x640xf32>
    tpu.vector_store %arg4[%c0_5, %c0_6], %11 {strides = array<i32>} : memref<32x640xf32, #tpu.memory_space<vmem>>, vector<32x640xf32>,
    return
  }
  func.func @transform_0(%arg0: i32) -> i32 {
    %c0_i32 = arith.constant 0 : i32
    %c0_i32_0 = arith.constant 0 : i32
    return %c0_i32 : i32
  }
  func.func @transform_1(%arg0: i32) -> (i32, i32) {
    %c0_i32 = arith.constant 0 : i32
    %c0_i32_0 = arith.constant 0 : i32
    %c0_i32_1 = arith.constant 0 : i32
    return %c0_i32, %c0_i32_0 : i32, i32
  }
  func.func @transform_2(%arg0: i32) -> (i32, i32) {
    %c0_i32 = arith.constant 0 : i32
    %c0_i32_0 = arith.constant 0 : i32
    return %arg0, %c0_i32 : i32, i32
  }
  func.func @transform_3(%arg0: i32) -> (i32, i32) {
    %c0_i32 = arith.constant 0 : i32
    %c0_i32_0 = arith.constant 0 : i32
    return %arg0, %c0_i32 : i32, i32
  }
}

</mosaic_0001>

<bundles_post_ra>
// kernel: tile.5
= control target key start
LH: loop header
LB: loop body
LE: loop exit
PB: predicated region body
PF: predicated region fallthrough
CT: control target
= control target key end

     0   :  { %s163_s10 = smov 38   ;;  %s164_s11 = smov 34   ;;  %vm3_vm0 = vcmask 15360   ;;  %vm9_vm1 = vcmask 326960   ;;  %vm15_vm2 = vcmask 310560   ;;  %vm21_vm3 = vcmask 294160   ;;  %s255_s0 = inlined_call_operand.vmem [shape: f32[20,2], index: 0, kind: input, shape index: {}]   ;;  %s256_s1 = inlined_call_operand.vmem [shape: f32[40], index: 1, kind: output, shape index: {}]  }
   0x1   :  { %v125_v0 = vld [vmem:[%s255_s0 + $0x13] sm:$0x1]   ;;  %v127_v1 = vld [vmem:[%s255_s0 + $0x11] sm:$0x1]   ;;  %v126_v2 = vld [vmem:[%s255_s0 + $0x12] sm:$0x1]  }
   0x2   :  { %7 = vrot.lane.b32.xlu0 %v125_v0, %s163_s10  ;;  %19 = vrot.lane.b32.xlu1 %v127_v1, %s164_s11  ;;  %v128_v3 = vld [vmem:[%s255_s0 + $0x10] sm:$0x1]   ;;  %s165_s16 = smov 36   ;;  %s166_s17 = smov 32   ;;  %v129_v4 = vld [vmem:[%s255_s0 + $0xf] sm:$0x1]  }
   0x3   :  { %v130_v5 = vld [vmem:[%s255_s0 + $0xe] sm:$0x1]   ;;  %s167_s22 = smov 30   ;;  %s168_s23 = smov 28   ;;  %v131_v6 = vld [vmem:[%s255_s0 + $0xd] sm:$0x1]  }
   0x4   :  { %v2_v7 = vld [vmem:[%s255_s0] sm:$0x1]   ;;  %v132_v8 = vld [vmem:[%s255_s0 + $0xc] sm:$0x1]   ;;  %s169_s30 = smov 26   ;;  %s170_s2 = smov 24  }
   0x5   :  { %4 = vst.msk [vmem:[#allocation0] sm:$0x1] %vm3_vm0, %v2_v7   ;;  %v133_v9 = vld [vmem:[%s255_s0 + $0xb] sm:$0x1]   ;;  %v134_v10 = vld [vmem:[%s255_s0 + $0xa] sm:$0x1]  }
   0x6   :  { %13 = vrot.lane.b32.xlu0 %v126_v2, %s165_s16  ;;  %25 = vrot.lane.b32.xlu1 %v128_v3, %s166_s17  ;;  %s171_s7 = smov 22   ;;  %s172_s8 = smov 20   ;;  %v135_v11 = vld [vmem:[%s255_s0 + $0x9] sm:$0x1]   ;;  %v136_v12 = vld [vmem:[%s255_s0 + $0x8] sm:$0x1]  }
   0x7   :  { %s173_s13 = smov 18   ;;  %s174_s14 = smov 16   ;;  %v137_v13 = vld [vmem:[%s255_s0 + $0x7] sm:$0x1]   ;;  %v138_v14 = vld [vmem:[%s255_s0 + $0x6] sm:$0x1]  }
   0x8   :  { %s175_s19 = smov 14   ;;  %s176_s20 = smov 12   ;;  %v139_v15 = vld [vmem:[%s255_s0 + $0x5] sm:$0x1]   ;;  %v140_v16 = vld [vmem:[%s255_s0 + $0x4] sm:$0x1]  }
   0x9   :  { %s177_s25 = smov 10   ;;  %s178_s26 = smov 8   ;;  %v141_v17 = vld [vmem:[%s255_s0 + $0x3] sm:$0x1]   ;;  %v142_v18 = vld [vmem:[%s255_s0 + $0x2] sm:$0x1]  }
   0xa   :  { %31 = vrot.lane.b32.xlu0 %v129_v4, %s167_s22  ;;  %37 = vrot.lane.b32.xlu1 %v130_v5, %s168_s23  ;;  %s180_s3 = smov 4   ;;  %v143_v19 = vld [vmem:[%s255_s0 + $0x1] sm:$0x1]   ;;  %s181_s0 = smov 2   ;;  %vm27_vm4 = vcmask 277760   ;;  %vm33_vm5 = vcmask 261360  }
   0xb   :  { %vm39_vm6 = vcmask 244960   ;;  %vm45_vm7 = vcmask 228560   ;;  %vm51_vm8 = vcmask 212160   ;;  %vm57_vm9 = vcmask 195760  }
   0xc   :  { %vm63_vm10 = vcmask 179360   ;;  %vm69_vm11 = vcmask 162960   ;;  %vm75_vm12 = vcmask 146560   ;;  %vm81_vm13 = vcmask 130160  }
   0xd   :  { %vm87_vm14 = vcmask 113760   ;;  %vm93_vm15 = vcmask 97360   ;;  %vm99_vm0 = vcmask 80960  }
   0xe   :  { %43 = vrot.lane.b32.xlu0 %v131_v6, %s169_s30  ;;  %49 = vrot.lane.b32.xlu1 %v132_v8, %s170_s2  ;;  %s179_s2 = smov 6  }
  0x12   :  { %55 = vrot.lane.b32.xlu0 %v133_v9, %s171_s7  ;;  %61 = vrot.lane.b32.xlu1 %v134_v10, %s172_s8 }
  0x16   :  { %67 = vrot.lane.b32.xlu0 %v135_v11, %s173_s13  ;;  %73 = vrot.lane.b32.xlu1 %v136_v12, %s174_s14 }
  0x1a   :  { %79 = vrot.lane.b32.xlu0 %v137_v13, %s175_s19  ;;  %85 = vrot.lane.b32.xlu1 %v138_v14, %s176_s20 }
  0x1e   :  { %91 = vrot.lane.b32.xlu0 %v139_v15, %s177_s25  ;;  %97 = vrot.lane.b32.xlu1 %v140_v16, %s178_s26 }
  0x22   :  { %103 = vrot.lane.b32.xlu0 %v141_v17, %s179_s2  ;;  %109 = vrot.lane.b32.xlu1 %v142_v18, %s180_s3 }
  0x26   :  { %115 = vrot.lane.b32.xlu0 %v143_v19, %s181_s0 }
  0x74   :  { %v8_v20 = vpop.permute.xlu0 %7   ;;  %v20_v21 = vpop.permute.xlu1 %19  }
  0x75   :  { %10 = vst.msk [vmem:[#allocation0] sm:$0x1] %vm9_vm1, %v8_v20   ;;  %vm105_vm1 = vcmask 64560  }
  0x78   :  { %v14_v22 = vpop.permute.xlu0 %13   ;;  %v26_v23 = vpop.permute.xlu1 %25  }
  0x79   :  { %16 = vst.msk [vmem:[#allocation0] sm:$0x1] %vm15_vm2, %v14_v22   ;;  %vm111_vm2 = vcmask 48160  }
  0x7a   :  { %22 = vst.msk [vmem:[#allocation0] sm:$0x1] %vm21_vm3, %v20_v21   ;;  %vm117_vm3 = vcmask 31760  }
  0x7b   :  { %28 = vst.msk [vmem:[#allocation0] sm:$0x1] %vm27_vm4, %v26_v23  }
  0x7c   :  { %v32_v24 = vpop.permute.xlu0 %31   ;;  %v38_v25 = vpop.permute.xlu1 %37  }
  0x7d   :  { %34 = vst.msk [vmem:[#allocation0] sm:$0x1] %vm33_vm5, %v32_v24  }
  0x7e   :  { %40 = vst.msk [vmem:[#allocation0] sm:$0x1] %vm39_vm6, %v38_v25  }
  0x80   :  { %v44_v26 = vpop.permute.xlu0 %43   ;;  %v50_v27 = vpop.permute.xlu1 %49  }
  0x81   :  { %46 = vst.msk [vmem:[#allocation0] sm:$0x1] %vm45_vm7, %v44_v26  }
  0x82   :  { %52 = vst.msk [vmem:[#allocation0] sm:$0x1] %vm51_vm8, %v50_v27  }
  0x84   :  { %v56_v28 = vpop.permute.xlu0 %55   ;;  %v62_v29 = vpop.permute.xlu1 %61  }
  0x85   :  { %58 = vst.msk [vmem:[#allocation0] sm:$0x1] %vm57_vm9, %v56_v28  }
  0x86   :  { %64 = vst.msk [vmem:[#allocation0] sm:$0x1] %vm63_vm10, %v62_v29  }
  0x88   :  { %v68_v30 = vpop.permute.xlu0 %67   ;;  %v74_v31 = vpop.permute.xlu1 %73  }
  0x89   :  { %70 = vst.msk [vmem:[#allocation0] sm:$0x1] %vm69_vm11, %v68_v30  }
  0x8a   :  { %76 = vst.msk [vmem:[#allocation0] sm:$0x1] %vm75_vm12, %v74_v31  }
  0x8c   :  { %v80_v32 = vpop.permute.xlu0 %79   ;;  %v86_v33 = vpop.permute.xlu1 %85  }
  0x8d   :  { %82 = vst.msk [vmem:[#allocation0] sm:$0x1] %vm81_vm13, %v80_v32  }
  0x8e   :  { %88 = vst.msk [vmem:[#allocation0] sm:$0x1] %vm87_vm14, %v86_v33  }
  0x90   :  { %v92_v34 = vpop.permute.xlu0 %91   ;;  %v98_v35 = vpop.permute.xlu1 %97  }
  0x91   :  { %94 = vst.msk [vmem:[#allocation0] sm:$0x1] %vm93_vm15, %v92_v34  }
  0x92   :  { %100 = vst.msk [vmem:[#allocation0] sm:$0x1] %vm99_vm0, %v98_v35  }
  0x94   :  { %v104_v36 = vpop.permute.xlu0 %103   ;;  %v110_v37 = vpop.permute.xlu1 %109  }
  0x95   :  { %106 = vst.msk [vmem:[#allocation0] sm:$0x1] %vm105_vm1, %v104_v36  }
  0x96   :  { %112 = vst.msk [vmem:[#allocation0] sm:$0x1] %vm111_vm2, %v110_v37  }
  0x98   :  { %v116_v38 = vpop.permute.xlu0 %115  }
  0x99   :  { %118 = vst.msk [vmem:[#allocation0] sm:$0x1] %vm117_vm3, %v116_v38  }
  0xa0   :  { %v122_v39 = vld [vmem:[#allocation0] sm:$0x1] }
  0xa1   :  { %124 = vst [vmem:[%s256_s1] sm:$0x1] %v122_v39 }

// kernel: tile.6
= control target key start
LH: loop header
LB: loop body
LE: loop exit
PB: predicated region body
PF: predicated region fallthrough
CT: control target
= control target key end

     0   :  { %s28_s0 = inlined_call_operand.vmem [shape: f32[40], index: 0, kind: input, shape index: {}]   ;;  %s29_s1 = inlined_call_operand.vmem [shape: f32[16,40], index: 1, kind: output, shape index: {}]  }
   0x1   :  { %v4_v0 = vld [vmem:[%s28_s0] ss:$0 sm:$0xff] }
   0x2   :  { %5 = vst [vmem:[%s29_s1] sm:$0xff] %v4_v0  ;;  %8 = vst [vmem:[%s29_s1 + $0x8] sm:$0xff] %v4_v0 }

// kernel: tile.7
= control target key start
LH: loop header
LB: loop body
LE: loop exit
PB: predicated region body
PF: predicated region fallthrough
CT: control target
= control target key end

     0   :  { %vm9_vm0 = vcmask 64512   ;;  %vm26_vm1 = vcmask 195584   ;;  %s205_s14 = smov 120   ;;  %vm22_vm2 = vcmask 130048   ;;  %s206_s19 = smov 104   ;;  %vm13_vm3 = vcmask 261120   ;;  %s313_s0 = inlined_call_operand.vmem [shape: f32[16,40], index: 0, kind: input, shape index: {}]   ;;  %s314_s1 = inlined_call_operand.vmem [shape: f32[1,640], index: 1, kind: output, shape index: {}]  }
   0x1   :  { %v167_v0 = vld [vmem:[%s313_s0 + $0x3] sm:$0x1]   ;;  %v171_v3 = vld [vmem:[%s313_s0 + $0x9] sm:$0x1]   ;;  %v169_v6 = vld [vmem:[%s313_s0 + $0x6] sm:$0x1]  }
   0x2   :  { %v168_v1 = vld [vmem:[%s313_s0 + $0x3] sm:$0x1]   ;;  %v172_v4 = vld [vmem:[%s313_s0 + $0x9] sm:$0x1]   ;;  %v170_v7 = vld [vmem:[%s313_s0 + $0x6] sm:$0x1]  }
   0x3   :  { %v10_v2 = vsel %vm9_vm0, %v168_v1, %v167_v0  ;;  %v37_v5 = vsel %vm26_vm1, %v172_v4, %v171_v3  ;;  %v23_v8 = vsel %vm22_vm2, %v170_v7, %v169_v6  ;;  %v173_v9 = vld [vmem:[%s313_s0 + $0xc] sm:$0x1]   ;;  %s207_s24 = smov 112   ;;  %s208_s25 = smov 96   ;;  %v175_v12 = vld [vmem:[%s313_s0 + $0xf] sm:$0x1]  }
   0x4   :  { %11 = vrot.lane.b32.xlu0 %v10_v2, %s205_s14  ;;  %38 = vrot.lane.b32.xlu1 %v37_v5, %s206_s19  ;;  %v174_v10 = vld [vmem:[%s313_s0 + $0xc] sm:$0x1]   ;;  %v176_v13 = vld [vmem:[%s313_s0 + $0x2] sm:$0x1]   ;;  %s209_s3 = smov 88   ;;  %vm3_vm4 = vcmask 326656  }
   0x5   :  { %v51_v11 = vsel %vm13_vm3, %v174_v10, %v173_v9  ;;  %v2_v14 = vld [vmem:[%s313_s0] sm:$0x1]   ;;  %s210_s4 = smov 80   ;;  %v177_v15 = vld [vmem:[%s313_s0 + $0x5] sm:$0x1]   ;;  %s211_s9 = smov 72  }
   0x6   :  { %4 = vst.msk [vmem:[#allocation0] sm:$0x1] %vm3_vm4, %v2_v14   ;;  %v178_v16 = vld [vmem:[%s313_s0 + $0x8] sm:$0x1]   ;;  %s212_s10 = smov 64   ;;  %s213_s15 = smov 56  }
   0x7   :  { %v179_v17 = vld [vmem:[%s313_s0 + $0xb] sm:$0x1]   ;;  %v180_v18 = vld [vmem:[%s313_s0 + $0xe] sm:$0x1]   ;;  %s214_s16 = smov 48   ;;  %s215_s21 = smov 40  }
   0x8   :  { %24 = vrot.lane.b32.xlu0 %v23_v8, %s207_s24  ;;  %52 = vrot.lane.b32.xlu1 %v51_v11, %s208_s25  ;;  %v181_v19 = vld [vmem:[%s313_s0 + $0x1] sm:$0x1]   ;;  %v182_v20 = vld [vmem:[%s313_s0 + $0x4] sm:$0x1]   ;;  %s216_s22 = smov 32   ;;  %s217_s27 = smov 24  }
   0x9   :  { %v183_v21 = vld [vmem:[%s313_s0 + $0x7] sm:$0x1]   ;;  %v184_v22 = vld [vmem:[%s313_s0 + $0xa] sm:$0x1]   ;;  %s218_s28 = smov 16   ;;  %vm16_vm5 = vcmask 1048512  }
   0xa   :  { %v185_v23 = vld [vmem:[%s313_s0 + $0xd] sm:$0x1]   ;;  %s219_s0 = smov 8   ;;  %vm29_vm6 = vcmask 1048448   ;;  %vm43_vm7 = vcmask 1048384   ;;  %vm57_vm8 = vcmask 1048320  }
   0xb   :  { %vm64_vm9 = vcmask 1048256   ;;  %vm71_vm10 = vcmask 982656   ;;  %vm77_vm11 = vcmask 917056   ;;  %vm84_vm12 = vcmask 851456  }
   0xc   :  { %62 = vrot.lane.b32.xlu0 %v175_v12, %s209_s3  ;;  %69 = vrot.lane.b32.xlu1 %v176_v13, %s210_s4  ;;  %vm91_vm13 = vcmask 785856   ;;  %vm98_vm14 = vcmask 720256   ;;  %vm105_vm15 = vcmask 654656  }
  0x10   :  { %75 = vrot.lane.b32.xlu0 %v177_v15, %s211_s9  ;;  %82 = vrot.lane.b32.xlu1 %v178_v16, %s212_s10 }
  0x14   :  { %89 = vrot.lane.b32.xlu0 %v179_v17, %s213_s15  ;;  %96 = vrot.lane.b32.xlu1 %v180_v18, %s214_s16 }
  0x18   :  { %103 = vrot.lane.b32.xlu0 %v181_v19, %s215_s21  ;;  %109 = vrot.lane.b32.xlu1 %v182_v20, %s216_s22 }
  0x1c   :  { %116 = vrot.lane.b32.xlu0 %v183_v21, %s217_s27  ;;  %123 = vrot.lane.b32.xlu1 %v184_v22, %s218_s28 }
  0x20   :  { %130 = vrot.lane.b32.xlu0 %v185_v23, %s219_s0 }
  0x76   :  { %v12_v24 = vpop.permute.xlu0 %11   ;;  %v39_v25 = vpop.permute.xlu1 %38  }
  0x77   :  { %15 = vst.msk [vmem:[#allocation0 + $0x8] sm:$0x1] %vm13_vm3, %v12_v24   ;;  %vm132_vm3 = vcmask 392256  }
  0x78   :  { %17 = vst.msk [vmem:[#allocation0] sm:$0x1] %vm16_vm5, %v12_v24  }
  0x79   :  { %42 = vst.msk [vmem:[#allocation0 + $0x18] sm:$0x1] %vm22_vm2, %v39_v25   ;;  %vm125_vm2 = vcmask 457856  }
  0x7a   :  { %v25_v26 = vpop.permute.xlu0 %24   ;;  %v53_v27 = vpop.permute.xlu1 %52  }
  0x7b   :  { %28 = vst.msk [vmem:[#allocation0 + $0x10] sm:$0x1] %vm26_vm1, %v25_v26   ;;  %vm118_vm1 = vcmask 523456  }
  0x7c   :  { %31 = vst.msk [vmem:[#allocation0 + $0x8] sm:$0x1] %vm29_vm6, %v25_v26  }
  0x7d   :  { %45 = vst.msk [vmem:[#allocation0 + $0x10] sm:$0x1] %vm43_vm7, %v39_v25  }
  0x7e   :  { %56 = vst.msk [vmem:[#allocation0 + $0x20] sm:$0x1] %vm9_vm0, %v53_v27   ;;  %v63_v28 = vpop.permute.xlu0 %62   ;;  %v70_v29 = vpop.permute.xlu1 %69   ;;  %vm111_vm0 = vcmask 589056  }
  0x7f   :  { %59 = vst.msk [vmem:[#allocation0 + $0x18] sm:$0x1] %vm57_vm8, %v53_v27  }
  0x80   :  { %66 = vst.msk [vmem:[#allocation0 + $0x20] sm:$0x1] %vm64_vm9, %v63_v28  }
  0x81   :  { %72 = vst.msk [vmem:[#allocation0] sm:$0x1] %vm71_vm10, %v70_v29  }
  0x82   :  { %v76_v30 = vpop.permute.xlu0 %75   ;;  %v83_v31 = vpop.permute.xlu1 %82  }
  0x83   :  { %79 = vst.msk [vmem:[#allocation0 + $0x8] sm:$0x1] %vm77_vm11, %v76_v30  }
  0x84   :  { %86 = vst.msk [vmem:[#allocation0 + $0x10] sm:$0x1] %vm84_vm12, %v83_v31  }
  0x86   :  { %v90_v32 = vpop.permute.xlu0 %89   ;;  %v97_v33 = vpop.permute.xlu1 %96  }
  0x87   :  { %93 = vst.msk [vmem:[#allocation0 + $0x18] sm:$0x1] %vm91_vm13, %v90_v32  }
  0x88   :  { %100 = vst.msk [vmem:[#allocation0 + $0x20] sm:$0x1] %vm98_vm14, %v97_v33  }
  0x8a   :  { %v104_v34 = vpop.permute.xlu0 %103   ;;  %v110_v35 = vpop.permute.xlu1 %109  }
  0x8b   :  { %106 = vst.msk [vmem:[#allocation0] sm:$0x1] %vm105_vm15, %v104_v34  }
  0x8c   :  { %113 = vst.msk [vmem:[#allocation0 + $0x8] sm:$0x1] %vm111_vm0, %v110_v35  }
  0x8e   :  { %v117_v36 = vpop.permute.xlu0 %116   ;;  %v124_v37 = vpop.permute.xlu1 %123  }
  0x8f   :  { %120 = vst.msk [vmem:[#allocation0 + $0x10] sm:$0x1] %vm118_vm1, %v117_v36  }
  0x90   :  { %127 = vst.msk [vmem:[#allocation0 + $0x18] sm:$0x1] %vm125_vm2, %v124_v37  }
  0x92   :  { %v138_v38 = vld [vmem:[#allocation0] sm:$0x1]  ;;  %v131_v39 = vpop.permute.xlu0 %130  }
  0x93   :  { %140 = vst [vmem:[%s314_s1] sm:$0x1] %v138_v38  ;;  %v142_v40 = vld [vmem:[#allocation0 + $0x8] sm:$0x1]  ;;  %134 = vst.msk [vmem:[#allocation0 + $0x20] sm:$0x1] %vm132_vm3, %v131_v39  }
  0x94   :  { %186 = vst [vmem:[%s314_s1 + $0x1] sm:$0x1] %v142_v40 }
  0x96   :  { %v147_v41 = vld [vmem:[#allocation0 + $0x10] sm:$0x1] }
  0x97   :  { %187 = vst [vmem:[%s314_s1 + $0x2] sm:$0x1] %v147_v41  ;;  %v153_v42 = vld [vmem:[#allocation0 + $0x18] sm:$0x1] }
  0x98   :  { %188 = vst [vmem:[%s314_s1 + $0x3] sm:$0x1] %v153_v42 }
  0x9a   :  { %v159_v43 = vld [vmem:[#allocation0 + $0x20] sm:$0x1] }
  0x9b   :  { %189 = vst [vmem:[%s314_s1 + $0x4] sm:$0x1] %v159_v43 }

// kernel: squeeze.5
= control target key start
LH: loop header
LB: loop body
LE: loop exit
PB: predicated region body
PF: predicated region fallthrough
CT: control target
= control target key end

     0   :  { %2 = vsyncpa [#allocation1], 0  ;;  %s1811_s6 = smov [#allocation0]   ;;  %s2334_s0 = inlined_call_operand.hbm [shape: f32[1000,1,20,2], index: 0, kind: input, shape index: {}]   ;;  %s2335_s1 = inlined_call_operand.vmem [shape: f32[1000,40], index: 1, kind: output, shape index: {}]  }
   0x1   :  { %s7_s7 = sshll.u32 %s1811_s6, 4  ;;  %s1787_s10 = scalar_lea.hbm %s2334_s0, 5120  ;;  %s8_s7 = int_to_ptr.vmem [resolvable:$true] %s7_s7 }
   0x2   :  { %p1788_p0 = scmp.ne.s32.totalorder %s2334_s0, %s1787_s10  ;;  %p1791_p1 = scmp.lt.u32.totalorder %s1787_s10, %s2334_s0 }
   0x4   :  { %p1793_p2 = pnand %p1791_p1, %p1788_p0 }
   0x6   :  { %1796 = shalt.err (!%p1793_p2)
}
   0x7   :  { %s1797_s15 = scalar_lea.vmem %s8_s7, 5120  ;;  %p1802_p4 = scmp.lt.s32.totalorder %s8_s7, %s8_s7 }
   0x8   :  { %p1798_p3 = scmp.ne.s32.totalorder %s8_s7, %s1797_s15  ;;  %p1803_p5 = scmp.lt.s32.totalorder %s1797_s15, %s1797_s15 }
   0xa   :  { %p1804_p6 = por %p1803_p5, %p1802_p4 }
   0xc   :  { %p1805_p7 = pnand %p1804_p6, %p1798_p3 }
   0xe   :  { %1808 = shalt.err (!%p1805_p7)
}
   0xf   :  { %10 = dma.hbm_to_vmem [thread:$0]  %s2334_s0, 5120, %s8_s7, [#allocation1]  }
  0x10   :  { %1809 = dma.done.wait [#allocation1], 5120  }
  0x11   :  { %1810 = vsyncadd [#allocation1], 4294962176  ;;  %v16_v0 = vld [vmem:[#allocation0 + $0x13e] sm:$0x3]  ;;  %v21_v1 = vld [vmem:[#allocation0 + $0x13c] sm:$0x3] }
  0x12   :  { %v26_v2 = vld [vmem:[#allocation0 + $0x13a] sm:$0x3]  ;;  %18 = vst [vmem:[#allocation2 + $0x4f8] sm:$0x3] %v16_v0  ;;  %23 = vst [vmem:[#allocation2 + $0x4f0] sm:$0x3] %v21_v1 }
  0x13   :  { %28 = vst [vmem:[#allocation2 + $0x4e8] sm:$0x3] %v26_v2  ;;  %v31_v3 = vld [vmem:[#allocation0 + $0x138] sm:$0x3]  ;;  %v36_v4 = vld [vmem:[#allocation0 + $0x136] sm:$0x3] }
  0x14   :  { %v41_v5 = vld [vmem:[#allocation0 + $0x134] sm:$0x3]  ;;  %33 = vst [vmem:[#allocation2 + $0x4e0] sm:$0x3] %v31_v3  ;;  %38 = vst [vmem:[#allocation2 + $0x4d8] sm:$0x3] %v36_v4 }
  0x15   :  { %43 = vst [vmem:[#allocation2 + $0x4d0] sm:$0x3] %v41_v5  ;;  %v46_v6 = vld [vmem:[#allocation0 + $0x132] sm:$0x3]  ;;  %v51_v7 = vld [vmem:[#allocation0 + $0x130] sm:$0x3] }
  0x16   :  { %v56_v8 = vld [vmem:[#allocation0 + $0x12e] sm:$0x3]  ;;  %48 = vst [vmem:[#allocation2 + $0x4c8] sm:$0x3] %v46_v6  ;;  %53 = vst [vmem:[#allocation2 + $0x4c0] sm:$0x3] %v51_v7 }
  0x17   :  { %58 = vst [vmem:[#allocation2 + $0x4b8] sm:$0x3] %v56_v8  ;;  %v61_v9 = vld [vmem:[#allocation0 + $0x12c] sm:$0x3]  ;;  %v66_v10 = vld [vmem:[#allocation0 + $0x12a] sm:$0x3] }
  0x18   :  { %v71_v11 = vld [vmem:[#allocation0 + $0x128] sm:$0x3]  ;;  %63 = vst [vmem:[#allocation2 + $0x4b0] sm:$0x3] %v61_v9  ;;  %68 = vst [vmem:[#allocation2 + $0x4a8] sm:$0x3] %v66_v10 }
  0x19   :  { %73 = vst [vmem:[#allocation2 + $0x4a0] sm:$0x3] %v71_v11  ;;  %v76_v12 = vld [vmem:[#allocation0 + $0x126] sm:$0x3]  ;;  %v81_v13 = vld [vmem:[#allocation0 + $0x124] sm:$0x3] }
  0x1a   :  { %v86_v14 = vld [vmem:[#allocation0 + $0x122] sm:$0x3]  ;;  %78 = vst [vmem:[#allocation2 + $0x498] sm:$0x3] %v76_v12  ;;  %83 = vst [vmem:[#allocation2 + $0x490] sm:$0x3] %v81_v13 }
  0x1b   :  { %88 = vst [vmem:[#allocation2 + $0x488] sm:$0x3] %v86_v14  ;;  %v91_v15 = vld [vmem:[#allocation0 + $0x120] sm:$0x3]  ;;  %v96_v16 = vld [vmem:[#allocation0 + $0x11e] sm:$0x3] }
  0x1c   :  { %v101_v17 = vld [vmem:[#allocation0 + $0x11c] sm:$0x3]  ;;  %93 = vst [vmem:[#allocation2 + $0x480] sm:$0x3] %v91_v15  ;;  %98 = vst [vmem:[#allocation2 + $0x478] sm:$0x3] %v96_v16 }
  0x1d   :  { %103 = vst [vmem:[#allocation2 + $0x470] sm:$0x3] %v101_v17  ;;  %v106_v18 = vld [vmem:[#allocation0 + $0x11a] sm:$0x3]  ;;  %v111_v19 = vld [vmem:[#allocation0 + $0x118] sm:$0x3] }
  0x1e   :  { %v116_v20 = vld [vmem:[#allocation0 + $0x116] sm:$0x3]  ;;  %108 = vst [vmem:[#allocation2 + $0x468] sm:$0x3] %v106_v18  ;;  %113 = vst [vmem:[#allocation2 + $0x460] sm:$0x3] %v111_v19 }
  0x1f   :  { %118 = vst [vmem:[#allocation2 + $0x458] sm:$0x3] %v116_v20  ;;  %v121_v21 = vld [vmem:[#allocation0 + $0x114] sm:$0x3]  ;;  %v126_v22 = vld [vmem:[#allocation0 + $0x112] sm:$0x3] }
  0x20   :  { %v131_v23 = vld [vmem:[#allocation0 + $0x110] sm:$0x3]  ;;  %123 = vst [vmem:[#allocation2 + $0x450] sm:$0x3] %v121_v21  ;;  %128 = vst [vmem:[#allocation2 + $0x448] sm:$0x3] %v126_v22 }
  0x21   :  { %133 = vst [vmem:[#allocation2 + $0x440] sm:$0x3] %v131_v23  ;;  %v136_v24 = vld [vmem:[#allocation0 + $0x10e] sm:$0x3]  ;;  %v141_v25 = vld [vmem:[#allocation0 + $0x10c] sm:$0x3] }
  0x22   :  { %v146_v26 = vld [vmem:[#allocation0 + $0x10a] sm:$0x3]  ;;  %138 = vst [vmem:[#allocation2 + $0x438] sm:$0x3] %v136_v24  ;;  %143 = vst [vmem:[#allocation2 + $0x430] sm:$0x3] %v141_v25 }
  0x23   :  { %148 = vst [vmem:[#allocation2 + $0x428] sm:$0x3] %v146_v26  ;;  %v151_v27 = vld [vmem:[#allocation0 + $0x108] sm:$0x3]  ;;  %v156_v28 = vld [vmem:[#allocation0 + $0x106] sm:$0x3] }
  0x24   :  { %v161_v29 = vld [vmem:[#allocation0 + $0x104] sm:$0x3]  ;;  %153 = vst [vmem:[#allocation2 + $0x420] sm:$0x3] %v151_v27  ;;  %158 = vst [vmem:[#allocation2 + $0x418] sm:$0x3] %v156_v28 }
  0x25   :  { %163 = vst [vmem:[#allocation2 + $0x410] sm:$0x3] %v161_v29  ;;  %v166_v30 = vld [vmem:[#allocation0 + $0x102] sm:$0x3]  ;;  %v171_v31 = vld [vmem:[#allocation0 + $0x100] sm:$0x3] }
  0x26   :  { %v176_v32 = vld [vmem:[#allocation0 + $0xfe] sm:$0x3]  ;;  %168 = vst [vmem:[#allocation2 + $0x408] sm:$0x3] %v166_v30  ;;  %173 = vst [vmem:[#allocation2 + $0x400] sm:$0x3] %v171_v31 }
  0x27   :  { %178 = vst [vmem:[#allocation2 + $0x3f8] sm:$0x3] %v176_v32  ;;  %v181_v33 = vld [vmem:[#allocation0 + $0xfc] sm:$0x3]  ;;  %v186_v34 = vld [vmem:[#allocation0 + $0xfa] sm:$0x3] }
  0x28   :  { %v191_v35 = vld [vmem:[#allocation0 + $0xf8] sm:$0x3]  ;;  %183 = vst [vmem:[#allocation2 + $0x3f0] sm:$0x3] %v181_v33  ;;  %188 = vst [vmem:[#allocation2 + $0x3e8] sm:$0x3] %v186_v34 }
  0x29   :  { %193 = vst [vmem:[#allocation2 + $0x3e0] sm:$0x3] %v191_v35  ;;  %v196_v36 = vld [vmem:[#allocation0 + $0xf6] sm:$0x3]  ;;  %v201_v37 = vld [vmem:[#allocation0 + $0xf4] sm:$0x3] }
  0x2a   :  { %v206_v38 = vld [vmem:[#allocation0 + $0xf2] sm:$0x3]  ;;  %198 = vst [vmem:[#allocation2 + $0x3d8] sm:$0x3] %v196_v36  ;;  %203 = vst [vmem:[#allocation2 + $0x3d0] sm:$0x3] %v201_v37 }
  0x2b   :  { %208 = vst [vmem:[#allocation2 + $0x3c8] sm:$0x3] %v206_v38  ;;  %v211_v39 = vld [vmem:[#allocation0 + $0xf0] sm:$0x3]  ;;  %v216_v40 = vld [vmem:[#allocation0 + $0xee] sm:$0x3] }
  0x2c   :  { %v221_v41 = vld [vmem:[#allocation0 + $0xec] sm:$0x3]  ;;  %213 = vst [vmem:[#allocation2 + $0x3c0] sm:$0x3] %v211_v39  ;;  %218 = vst [vmem:[#allocation2 + $0x3b8] sm:$0x3] %v216_v40 }
  0x2d   :  { %223 = vst [vmem:[#allocation2 + $0x3b0] sm:$0x3] %v221_v41  ;;  %v226_v42 = vld [vmem:[#allocation0 + $0xea] sm:$0x3]  ;;  %v231_v43 = vld [vmem:[#allocation0 + $0xe8] sm:$0x3] }
  0x2e   :  { %v236_v44 = vld [vmem:[#allocation0 + $0xe6] sm:$0x3]  ;;  %228 = vst [vmem:[#allocation2 + $0x3a8] sm:$0x3] %v226_v42  ;;  %233 = vst [vmem:[#allocation2 + $0x3a0] sm:$0x3] %v231_v43 }
  0x2f   :  { %238 = vst [vmem:[#allocation2 + $0x398] sm:$0x3] %v236_v44  ;;  %v241_v45 = vld [vmem:[#allocation0 + $0xe4] sm:$0x3]  ;;  %v246_v46 = vld [vmem:[#allocation0 + $0xe2] sm:$0x3] }
  0x30   :  { %v251_v47 = vld [vmem:[#allocation0 + $0xe0] sm:$0x3]  ;;  %243 = vst [vmem:[#allocation2 + $0x390] sm:$0x3] %v241_v45  ;;  %248 = vst [vmem:[#allocation2 + $0x388] sm:$0x3] %v246_v46 }
  0x31   :  { %253 = vst [vmem:[#allocation2 + $0x380] sm:$0x3] %v251_v47  ;;  %v256_v48 = vld [vmem:[#allocation0 + $0xde] sm:$0x3]  ;;  %v261_v49 = vld [vmem:[#allocation0 + $0xdc] sm:$0x3] }
  0x32   :  { %v266_v50 = vld [vmem:[#allocation0 + $0xda] sm:$0x3]  ;;  %258 = vst [vmem:[#allocation2 + $0x378] sm:$0x3] %v256_v48  ;;  %263 = vst [vmem:[#allocation2 + $0x370] sm:$0x3] %v261_v49 }
  0x33   :  { %268 = vst [vmem:[#allocation2 + $0x368] sm:$0x3] %v266_v50  ;;  %v271_v51 = vld [vmem:[#allocation0 + $0xd8] sm:$0x3]  ;;  %v276_v52 = vld [vmem:[#allocation0 + $0xd6] sm:$0x3] }
  0x34   :  { %v281_v53 = vld [vmem:[#allocation0 + $0xd4] sm:$0x3]  ;;  %273 = vst [vmem:[#allocation2 + $0x360] sm:$0x3] %v271_v51  ;;  %278 = vst [vmem:[#allocation2 + $0x358] sm:$0x3] %v276_v52 }
  0x35   :  { %283 = vst [vmem:[#allocation2 + $0x350] sm:$0x3] %v281_v53  ;;  %v286_v54 = vld [vmem:[#allocation0 + $0xd2] sm:$0x3]  ;;  %v291_v55 = vld [vmem:[#allocation0 + $0xd0] sm:$0x3] }
  0x36   :  { %v296_v56 = vld [vmem:[#allocation0 + $0xce] sm:$0x3]  ;;  %288 = vst [vmem:[#allocation2 + $0x348] sm:$0x3] %v286_v54  ;;  %293 = vst [vmem:[#allocation2 + $0x340] sm:$0x3] %v291_v55 }
  0x37   :  { %298 = vst [vmem:[#allocation2 + $0x338] sm:$0x3] %v296_v56  ;;  %v301_v57 = vld [vmem:[#allocation0 + $0xcc] sm:$0x3]  ;;  %v306_v58 = vld [vmem:[#allocation0 + $0xca] sm:$0x3] }
  0x38   :  { %v311_v59 = vld [vmem:[#allocation0 + $0xc8] sm:$0x3]  ;;  %303 = vst [vmem:[#allocation2 + $0x330] sm:$0x3] %v301_v57  ;;  %308 = vst [vmem:[#allocation2 + $0x328] sm:$0x3] %v306_v58 }
  0x39   :  { %313 = vst [vmem:[#allocation2 + $0x320] sm:$0x3] %v311_v59  ;;  %v316_v60 = vld [vmem:[#allocation0 + $0xc6] sm:$0x3]  ;;  %v321_v61 = vld [vmem:[#allocation0 + $0xc4] sm:$0x3] }
  0x3a   :  { %v326_v62 = vld [vmem:[#allocation0 + $0xc2] sm:$0x3]  ;;  %318 = vst [vmem:[#allocation2 + $0x318] sm:$0x3] %v316_v60  ;;  %323 = vst [vmem:[#allocation2 + $0x310] sm:$0x3] %v321_v61 }
  0x3b   :  { %328 = vst [vmem:[#allocation2 + $0x308] sm:$0x3] %v326_v62  ;;  %v331_v63 = vld [vmem:[#allocation0 + $0xc0] sm:$0x3]  ;;  %v336_v0 = vld [vmem:[#allocation0 + $0xbe] sm:$0x3] }
  0x3c   :  { %v341_v1 = vld [vmem:[#allocation0 + $0xbc] sm:$0x3]  ;;  %333 = vst [vmem:[#allocation2 + $0x300] sm:$0x3] %v331_v63  ;;  %338 = vst [vmem:[#allocation2 + $0x2f8] sm:$0x3] %v336_v0 }
  0x3d   :  { %343 = vst [vmem:[#allocation2 + $0x2f0] sm:$0x3] %v341_v1  ;;  %v346_v2 = vld [vmem:[#allocation0 + $0xba] sm:$0x3]  ;;  %v351_v3 = vld [vmem:[#allocation0 + $0xb8] sm:$0x3] }
  0x3e   :  { %v356_v4 = vld [vmem:[#allocation0 + $0xb6] sm:$0x3]  ;;  %348 = vst [vmem:[#allocation2 + $0x2e8] sm:$0x3] %v346_v2  ;;  %353 = vst [vmem:[#allocation2 + $0x2e0] sm:$0x3] %v351_v3 }
  0x3f   :  { %358 = vst [vmem:[#allocation2 + $0x2d8] sm:$0x3] %v356_v4  ;;  %v361_v5 = vld [vmem:[#allocation0 + $0xb4] sm:$0x3]  ;;  %v366_v6 = vld [vmem:[#allocation0 + $0xb2] sm:$0x3] }
  0x40   :  { %v371_v7 = vld [vmem:[#allocation0 + $0xb0] sm:$0x3]  ;;  %363 = vst [vmem:[#allocation2 + $0x2d0] sm:$0x3] %v361_v5  ;;  %368 = vst [vmem:[#allocation2 + $0x2c8] sm:$0x3] %v366_v6 }
  0x41   :  { %373 = vst [vmem:[#allocation2 + $0x2c0] sm:$0x3] %v371_v7  ;;  %v376_v8 = vld [vmem:[#allocation0 + $0xae] sm:$0x3]  ;;  %v381_v9 = vld [vmem:[#allocation0 + $0xac] sm:$0x3] }
  0x42   :  { %v386_v10 = vld [vmem:[#allocation0 + $0xaa] sm:$0x3]  ;;  %378 = vst [vmem:[#allocation2 + $0x2b8] sm:$0x3] %v376_v8  ;;  %383 = vst [vmem:[#allocation2 + $0x2b0] sm:$0x3] %v381_v9 }
  0x43   :  { %388 = vst [vmem:[#allocation2 + $0x2a8] sm:$0x3] %v386_v10  ;;  %v391_v11 = vld [vmem:[#allocation0 + $0xa8] sm:$0x3]  ;;  %v396_v12 = vld [vmem:[#allocation0 + $0xa6] sm:$0x3] }
  0x44   :  { %v401_v13 = vld [vmem:[#allocation0 + $0xa4] sm:$0x3]  ;;  %393 = vst [vmem:[#allocation2 + $0x2a0] sm:$0x3] %v391_v11  ;;  %398 = vst [vmem:[#allocation2 + $0x298] sm:$0x3] %v396_v12 }
  0x45   :  { %403 = vst [vmem:[#allocation2 + $0x290] sm:$0x3] %v401_v13  ;;  %v406_v14 = vld [vmem:[#allocation0 + $0xa2] sm:$0x3]  ;;  %v411_v15 = vld [vmem:[#allocation0 + $0xa0] sm:$0x3] }
  0x46   :  { %v416_v16 = vld [vmem:[#allocation0 + $0x9e] sm:$0x3]  ;;  %408 = vst [vmem:[#allocation2 + $0x288] sm:$0x3] %v406_v14  ;;  %413 = vst [vmem:[#allocation2 + $0x280] sm:$0x3] %v411_v15 }
  0x47   :  { %418 = vst [vmem:[#allocation2 + $0x278] sm:$0x3] %v416_v16  ;;  %v421_v17 = vld [vmem:[#allocation0 + $0x9c] sm:$0x3]  ;;  %v426_v18 = vld [vmem:[#allocation0 + $0x9a] sm:$0x3] }
  0x48   :  { %v431_v19 = vld [vmem:[#allocation0 + $0x98] sm:$0x3]  ;;  %423 = vst [vmem:[#allocation2 + $0x270] sm:$0x3] %v421_v17  ;;  %428 = vst [vmem:[#allocation2 + $0x268] sm:$0x3] %v426_v18 }
  0x49   :  { %433 = vst [vmem:[#allocation2 + $0x260] sm:$0x3] %v431_v19  ;;  %v436_v20 = vld [vmem:[#allocation0 + $0x96] sm:$0x3]  ;;  %v441_v21 = vld [vmem:[#allocation0 + $0x94] sm:$0x3] }
  0x4a   :  { %v446_v22 = vld [vmem:[#allocation0 + $0x92] sm:$0x3]  ;;  %438 = vst [vmem:[#allocation2 + $0x258] sm:$0x3] %v436_v20  ;;  %443 = vst [vmem:[#allocation2 + $0x250] sm:$0x3] %v441_v21 }
  0x4b   :  { %448 = vst [vmem:[#allocation2 + $0x248] sm:$0x3] %v446_v22  ;;  %v451_v23 = vld [vmem:[#allocation0 + $0x90] sm:$0x3]  ;;  %v456_v24 = vld [vmem:[#allocation0 + $0x8e] sm:$0x3] }
  0x4c   :  { %v461_v25 = vld [vmem:[#allocation0 + $0x8c] sm:$0x3]  ;;  %453 = vst [vmem:[#allocation2 + $0x240] sm:$0x3] %v451_v23  ;;  %458 = vst [vmem:[#allocation2 + $0x238] sm:$0x3] %v456_v24 }
  0x4d   :  { %463 = vst [vmem:[#allocation2 + $0x230] sm:$0x3] %v461_v25  ;;  %v466_v26 = vld [vmem:[#allocation0 + $0x8a] sm:$0x3]  ;;  %v471_v27 = vld [vmem:[#allocation0 + $0x88] sm:$0x3] }
  0x4e   :  { %v476_v28 = vld [vmem:[#allocation0 + $0x86] sm:$0x3]  ;;  %468 = vst [vmem:[#allocation2 + $0x228] sm:$0x3] %v466_v26  ;;  %473 = vst [vmem:[#allocation2 + $0x220] sm:$0x3] %v471_v27 }
  0x4f   :  { %478 = vst [vmem:[#allocation2 + $0x218] sm:$0x3] %v476_v28  ;;  %v481_v29 = vld [vmem:[#allocation0 + $0x84] sm:$0x3]  ;;  %v486_v30 = vld [vmem:[#allocation0 + $0x82] sm:$0x3] }
  0x50   :  { %v491_v31 = vld [vmem:[#allocation0 + $0x80] sm:$0x3]  ;;  %483 = vst [vmem:[#allocation2 + $0x210] sm:$0x3] %v481_v29  ;;  %488 = vst [vmem:[#allocation2 + $0x208] sm:$0x3] %v486_v30 }
  0x51   :  { %493 = vst [vmem:[#allocation2 + $0x200] sm:$0x3] %v491_v31  ;;  %v496_v32 = vld [vmem:[#allocation0 + $0x7e] sm:$0x3]  ;;  %v501_v33 = vld [vmem:[#allocation0 + $0x7c] sm:$0x3] }
  0x52   :  { %v506_v34 = vld [vmem:[#allocation0 + $0x7a] sm:$0x3]  ;;  %498 = vst [vmem:[#allocation2 + $0x1f8] sm:$0x3] %v496_v32  ;;  %503 = vst [vmem:[#allocation2 + $0x1f0] sm:$0x3] %v501_v33 }
  0x53   :  { %508 = vst [vmem:[#allocation2 + $0x1e8] sm:$0x3] %v506_v34  ;;  %v511_v35 = vld [vmem:[#allocation0 + $0x78] sm:$0x3]  ;;  %v516_v36 = vld [vmem:[#allocation0 + $0x76] sm:$0x3] }
  0x54   :  { %v521_v37 = vld [vmem:[#allocation0 + $0x74] sm:$0x3]  ;;  %513 = vst [vmem:[#allocation2 + $0x1e0] sm:$0x3] %v511_v35  ;;  %518 = vst [vmem:[#allocation2 + $0x1d8] sm:$0x3] %v516_v36 }
  0x55   :  { %523 = vst [vmem:[#allocation2 + $0x1d0] sm:$0x3] %v521_v37  ;;  %v526_v38 = vld [vmem:[#allocation0 + $0x72] sm:$0x3]  ;;  %v531_v39 = vld [vmem:[#allocation0 + $0x70] sm:$0x3] }
  0x56   :  { %v536_v40 = vld [vmem:[#allocation0 + $0x6e] sm:$0x3]  ;;  %528 = vst [vmem:[#allocation2 + $0x1c8] sm:$0x3] %v526_v38  ;;  %533 = vst [vmem:[#allocation2 + $0x1c0] sm:$0x3] %v531_v39 }
  0x57   :  { %538 = vst [vmem:[#allocation2 + $0x1b8] sm:$0x3] %v536_v40  ;;  %v541_v41 = vld [vmem:[#allocation0 + $0x6c] sm:$0x3]  ;;  %v546_v42 = vld [vmem:[#allocation0 + $0x6a] sm:$0x3] }
  0x58   :  { %v551_v43 = vld [vmem:[#allocation0 + $0x68] sm:$0x3]  ;;  %543 = vst [vmem:[#allocation2 + $0x1b0] sm:$0x3] %v541_v41  ;;  %548 = vst [vmem:[#allocation2 + $0x1a8] sm:$0x3] %v546_v42 }
  0x59   :  { %553 = vst [vmem:[#allocation2 + $0x1a0] sm:$0x3] %v551_v43  ;;  %v556_v44 = vld [vmem:[#allocation0 + $0x66] sm:$0x3]  ;;  %v561_v45 = vld [vmem:[#allocation0 + $0x64] sm:$0x3] }
  0x5a   :  { %v566_v46 = vld [vmem:[#allocation0 + $0x62] sm:$0x3]  ;;  %558 = vst [vmem:[#allocation2 + $0x198] sm:$0x3] %v556_v44  ;;  %563 = vst [vmem:[#allocation2 + $0x190] sm:$0x3] %v561_v45 }
  0x5b   :  { %568 = vst [vmem:[#allocation2 + $0x188] sm:$0x3] %v566_v46  ;;  %v571_v47 = vld [vmem:[#allocation0 + $0x60] sm:$0x3]  ;;  %v576_v48 = vld [vmem:[#allocation0 + $0x5e] sm:$0x3] }
  0x5c   :  { %v581_v49 = vld [vmem:[#allocation0 + $0x5c] sm:$0x3]  ;;  %573 = vst [vmem:[#allocation2 + $0x180] sm:$0x3] %v571_v47  ;;  %578 = vst [vmem:[#allocation2 + $0x178] sm:$0x3] %v576_v48 }
  0x5d   :  { %583 = vst [vmem:[#allocation2 + $0x170] sm:$0x3] %v581_v49  ;;  %v586_v50 = vld [vmem:[#allocation0 + $0x5a] sm:$0x3]  ;;  %v591_v51 = vld [vmem:[#allocation0 + $0x58] sm:$0x3] }
  0x5e   :  { %v596_v52 = vld [vmem:[#allocation0 + $0x56] sm:$0x3]  ;;  %588 = vst [vmem:[#allocation2 + $0x168] sm:$0x3] %v586_v50  ;;  %593 = vst [vmem:[#allocation2 + $0x160] sm:$0x3] %v591_v51 }
  0x5f   :  { %598 = vst [vmem:[#allocation2 + $0x158] sm:$0x3] %v596_v52  ;;  %v601_v53 = vld [vmem:[#allocation0 + $0x54] sm:$0x3]  ;;  %v606_v54 = vld [vmem:[#allocation0 + $0x52] sm:$0x3] }
  0x60   :  { %v611_v55 = vld [vmem:[#allocation0 + $0x50] sm:$0x3]  ;;  %603 = vst [vmem:[#allocation2 + $0x150] sm:$0x3] %v601_v53  ;;  %608 = vst [vmem:[#allocation2 + $0x148] sm:$0x3] %v606_v54 }
  0x61   :  { %613 = vst [vmem:[#allocation2 + $0x140] sm:$0x3] %v611_v55  ;;  %v616_v56 = vld [vmem:[#allocation0 + $0x4e] sm:$0x3]  ;;  %v621_v57 = vld [vmem:[#allocation0 + $0x4c] sm:$0x3] }
  0x62   :  { %v626_v58 = vld [vmem:[#allocation0 + $0x4a] sm:$0x3]  ;;  %618 = vst [vmem:[#allocation2 + $0x138] sm:$0x3] %v616_v56  ;;  %623 = vst [vmem:[#allocation2 + $0x130] sm:$0x3] %v621_v57 }
  0x63   :  { %628 = vst [vmem:[#allocation2 + $0x128] sm:$0x3] %v626_v58  ;;  %v631_v59 = vld [vmem:[#allocation0 + $0x48] sm:$0x3]  ;;  %v636_v60 = vld [vmem:[#allocation0 + $0x46] sm:$0x3] }
  0x64   :  { %v641_v61 = vld [vmem:[#allocation0 + $0x44] sm:$0x3]  ;;  %633 = vst [vmem:[#allocation2 + $0x120] sm:$0x3] %v631_v59  ;;  %638 = vst [vmem:[#allocation2 + $0x118] sm:$0x3] %v636_v60 }
  0x65   :  { %643 = vst [vmem:[#allocation2 + $0x110] sm:$0x3] %v641_v61  ;;  %v646_v62 = vld [vmem:[#allocation0 + $0x42] sm:$0x3]  ;;  %v651_v63 = vld [vmem:[#allocation0 + $0x40] sm:$0x3] }
  0x66   :  { %v656_v0 = vld [vmem:[#allocation0 + $0x3e] sm:$0x3]  ;;  %648 = vst [vmem:[#allocation2 + $0x108] sm:$0x3] %v646_v62  ;;  %653 = vst [vmem:[#allocation2 + $0x100] sm:$0x3] %v651_v63 }
  0x67   :  { %658 = vst [vmem:[#allocation2 + $0xf8] sm:$0x3] %v656_v0  ;;  %v661_v1 = vld [vmem:[#allocation0 + $0x3c] sm:$0x3]  ;;  %v666_v2 = vld [vmem:[#allocation0 + $0x3a] sm:$0x3] }
  0x68   :  { %v671_v3 = vld [vmem:[#allocation0 + $0x38] sm:$0x3]  ;;  %vm812_vm0 = vcmask 850944   ;;  %663 = vst [vmem:[#allocation2 + $0xf0] sm:$0x3] %v661_v1 }
  0x69   :  { %668 = vst [vmem:[#allocation2 + $0xe8] sm:$0x3] %v666_v2  ;;  %673 = vst [vmem:[#allocation2 + $0xe0] sm:$0x3] %v671_v3  ;;  %v676_v4 = vld [vmem:[#allocation0 + $0x36] sm:$0x3] }
  0x6a   :  { %v681_v5 = vld [vmem:[#allocation0 + $0x34] sm:$0x3]  ;;  %v686_v6 = vld [vmem:[#allocation0 + $0x32] sm:$0x3]  ;;  %678 = vst [vmem:[#allocation2 + $0xd8] sm:$0x3] %v676_v4 }
  0x6b   :  { %683 = vst [vmem:[#allocation2 + $0xd0] sm:$0x3] %v681_v5  ;;  %688 = vst [vmem:[#allocation2 + $0xc8] sm:$0x3] %v686_v6  ;;  %v691_v7 = vld [vmem:[#allocation0 + $0x30] sm:$0x3] }
  0x6c   :  { %v696_v8 = vld [vmem:[#allocation0 + $0x2e] sm:$0x3]  ;;  %v701_v9 = vld [vmem:[#allocation0 + $0x2c] sm:$0x3]  ;;  %693 = vst [vmem:[#allocation2 + $0xc0] sm:$0x3] %v691_v7 }
  0x6d   :  { %698 = vst [vmem:[#allocation2 + $0xb8] sm:$0x3] %v696_v8  ;;  %703 = vst [vmem:[#allocation2 + $0xb0] sm:$0x3] %v701_v9  ;;  %v706_v10 = vld [vmem:[#allocation0 + $0x2a] sm:$0x3] }
  0x6e   :  { %v711_v11 = vld [vmem:[#allocation0 + $0x28] sm:$0x3]  ;;  %v716_v12 = vld [vmem:[#allocation0 + $0x26] sm:$0x3]  ;;  %708 = vst [vmem:[#allocation2 + $0xa8] sm:$0x3] %v706_v10 }
  0x6f   :  { %713 = vst [vmem:[#allocation2 + $0xa0] sm:$0x3] %v711_v11  ;;  %718 = vst [vmem:[#allocation2 + $0x98] sm:$0x3] %v716_v12  ;;  %v721_v13 = vld [vmem:[#allocation0 + $0x24] sm:$0x3] }
  0x70   :  { %v726_v14 = vld [vmem:[#allocation0 + $0x22] sm:$0x3]  ;;  %v731_v15 = vld [vmem:[#allocation0 + $0x20] sm:$0x3]  ;;  %723 = vst [vmem:[#allocation2 + $0x90] sm:$0x3] %v721_v13 }
  0x71   :  { %728 = vst [vmem:[#allocation2 + $0x88] sm:$0x3] %v726_v14  ;;  %733 = vst [vmem:[#allocation2 + $0x80] sm:$0x3] %v731_v15  ;;  %v736_v16 = vld [vmem:[#allocation0 + $0x1e] sm:$0x3] }
  0x72   :  { %v741_v17 = vld [vmem:[#allocation0 + $0x1c] sm:$0x3]  ;;  %v746_v18 = vld [vmem:[#allocation0 + $0x1a] sm:$0x3]  ;;  %738 = vst [vmem:[#allocation2 + $0x78] sm:$0x3] %v736_v16 }
  0x73   :  { %743 = vst [vmem:[#allocation2 + $0x70] sm:$0x3] %v741_v17  ;;  %748 = vst [vmem:[#allocation2 + $0x68] sm:$0x3] %v746_v18  ;;  %v751_v19 = vld [vmem:[#allocation0 + $0x18] sm:$0x3] }
  0x74   :  { %v756_v20 = vld [vmem:[#allocation0 + $0x16] sm:$0x3]  ;;  %v761_v21 = vld [vmem:[#allocation0 + $0x14] sm:$0x3]  ;;  %753 = vst [vmem:[#allocation2 + $0x60] sm:$0x3] %v751_v19 }
  0x75   :  { %758 = vst [vmem:[#allocation2 + $0x58] sm:$0x3] %v756_v20  ;;  %763 = vst [vmem:[#allocation2 + $0x50] sm:$0x3] %v761_v21  ;;  %v766_v22 = vld [vmem:[#allocation0 + $0x12] sm:$0x3] }
  0x76   :  { %v771_v23 = vld [vmem:[#allocation0 + $0x10] sm:$0x3]  ;;  %v776_v24 = vld [vmem:[#allocation0 + $0xe] sm:$0x3]  ;;  %768 = vst [vmem:[#allocation2 + $0x48] sm:$0x3] %v766_v22 }
  0x77   :  { %773 = vst [vmem:[#allocation2 + $0x40] sm:$0x3] %v771_v23  ;;  %778 = vst [vmem:[#allocation2 + $0x38] sm:$0x3] %v776_v24  ;;  %v781_v25 = vld [vmem:[#allocation0 + $0xc] sm:$0x3] }
  0x78   :  { %v786_v26 = vld [vmem:[#allocation0 + $0xa] sm:$0x3]  ;;  %v791_v27 = vld [vmem:[#allocation0 + $0x8] sm:$0x3]  ;;  %783 = vst [vmem:[#allocation2 + $0x30] sm:$0x3] %v781_v25 }
  0x79   :  { %788 = vst [vmem:[#allocation2 + $0x28] sm:$0x3] %v786_v26  ;;  %793 = vst [vmem:[#allocation2 + $0x20] sm:$0x3] %v791_v27  ;;  %v796_v28 = vld [vmem:[#allocation0 + $0x6] sm:$0x3] }
  0x7a   :  { %v801_v29 = vld [vmem:[#allocation0 + $0x4] sm:$0x3]  ;;  %v805_v30 = vld [vmem:[#allocation0 + $0x2] sm:$0x3]  ;;  %798 = vst [vmem:[#allocation2 + $0x18] sm:$0x3] %v796_v28 }
  0x7b   :  { %803 = vst [vmem:[#allocation2 + $0x10] sm:$0x3] %v801_v29  ;;  %807 = vst [vmem:[#allocation2 + $0x8] sm:$0x3] %v805_v30  ;;  %v808_v31 = vld [vmem:[#allocation0] sm:$0x3] }
  0x7c   :  { %v821_v32 = vld [vmem:[#allocation2 + $0xb8] sm:$0x3]   ;;  %809 = vst [vmem:[#allocation2] sm:$0x3] %v808_v31  ;;  %v945_v61 = vld [vmem:[#allocation2 + $0x50] sm:$0x3]  }
  0x7d   :  { %v826_v33 = vld [vmem:[#allocation2 + $0xf8] sm:$0x3]   ;;  %1629 = vst.msk [vmem:[%s2335_s1 + $0x3c] sm:$0x3] %vm812_vm0, %v821_v32   ;;  %v941_v60 = vld [vmem:[#allocation2 + $0x48] sm:$0x3]  }
  0x7e   :  { %1630 = vst.msk [vmem:[%s2335_s1 + $0x3e] sm:$0x3] %vm812_vm0, %v826_v33   ;;  %v831_v34 = vld [vmem:[#allocation2 + $0x138] sm:$0x3]   ;;  %v937_v59 = vld [vmem:[#allocation2 + $0x40] sm:$0x3]  }
  0x7f   :  { %v836_v35 = vld [vmem:[#allocation2 + $0x178] sm:$0x3]   ;;  %1631 = vst.msk [vmem:[%s2335_s1 + $0x78] sm:$0x3] %vm812_vm0, %v831_v34   ;;  %v933_v58 = vld [vmem:[#allocation2 + $0x30] sm:$0x3]  }
  0x80   :  { %v841_v36 = vld [vmem:[#allocation2 + $0x1b8] sm:$0x3]   ;;  %1632 = vst.msk [vmem:[%s2335_s1 + $0x7a] sm:$0x3] %vm812_vm0, %v836_v35   ;;  %v925_v56 = vld [vmem:[#allocation2 + $0x20] sm:$0x3]  }
  0x81   :  { %1633 = vst.msk [vmem:[%s2335_s1 + $0x7c] sm:$0x3] %vm812_vm0, %v841_v36   ;;  %v846_v37 = vld [vmem:[#allocation2 + $0x1f8] sm:$0x3]   ;;  %v929_v57 = vld [vmem:[#allocation2 + $0x28] sm:$0x3]  }
  0x82   :  { %v851_v38 = vld [vmem:[#allocation2 + $0x238] sm:$0x3]   ;;  %1634 = vst.msk [vmem:[%s2335_s1 + $0x7e] sm:$0x3] %vm812_vm0, %v846_v37   ;;  %v913_v52 = vld [vmem:[#allocation2 + $0x8] sm:$0x3]  }
  0x83   :  { %v856_v39 = vld [vmem:[#allocation2 + $0x278] sm:$0x3]   ;;  %1635 = vst.msk [vmem:[%s2335_s1 + $0xb8] sm:$0x3] %vm812_vm0, %v851_v38   ;;  %v917_v53 = vld [vmem:[#allocation2 + $0x10] sm:$0x3]  }
  0x84   :  { %v816_v40 = vld [vmem:[#allocation2 + $0x78] sm:$0x3]   ;;  %1636 = vst.msk [vmem:[%s2335_s1 + $0xba] sm:$0x3] %vm812_vm0, %v856_v39   ;;  %v910_v55 = vld [vmem:[#allocation2] sm:$0x3]  }
  0x85   :  { %v861_v41 = vld [vmem:[#allocation2 + $0x2b8] sm:$0x3]   ;;  %1628 = vst.msk [vmem:[%s2335_s1 + $0x3a] sm:$0x3] %vm812_vm0, %v816_v40   ;;  %1647 = vst [vmem:[%s2335_s1 + $0x8] sm:$0x3] %v913_v52  }
  0x86   :  { %v866_v42 = vld [vmem:[#allocation2 + $0x2f8] sm:$0x3]   ;;  %1637 = vst.msk [vmem:[%s2335_s1 + $0xbc] sm:$0x3] %vm812_vm0, %v861_v41   ;;  %1648 = vst [vmem:[%s2335_s1 + $0x10] sm:$0x3] %v917_v53  }
  0x87   :  { %1638 = vst.msk [vmem:[%s2335_s1 + $0xbe] sm:$0x3] %vm812_vm0, %v866_v42   ;;  %v871_v43 = vld [vmem:[#allocation2 + $0x338] sm:$0x3]   ;;  %911 = vst [vmem:[%s2335_s1] sm:$0x3] %v910_v55  }
  0x88   :  { %v876_v44 = vld [vmem:[#allocation2 + $0x378] sm:$0x3]   ;;  %1639 = vst.msk [vmem:[%s2335_s1 + $0xf8] sm:$0x3] %vm812_vm0, %v871_v43   ;;  %1650 = vst [vmem:[%s2335_s1 + $0x20] sm:$0x3] %v925_v56  }
  0x89   :  { %v881_v45 = vld [vmem:[#allocation2 + $0x3b8] sm:$0x3]   ;;  %1640 = vst.msk [vmem:[%s2335_s1 + $0xfa] sm:$0x3] %vm812_vm0, %v876_v44   ;;  %1651 = vst [vmem:[%s2335_s1 + $0x28] sm:$0x3] %v929_v57  }
  0x8a   :  { %v811_v46 = vld [vmem:[#allocation2 + $0x38] sm:$0x3]   ;;  %1641 = vst.msk [vmem:[%s2335_s1 + $0xfc] sm:$0x3] %vm812_vm0, %v881_v45   ;;  %1652 = vst [vmem:[%s2335_s1 + $0x30] sm:$0x3] %v933_v58  }
  0x8b   :  { %v886_v47 = vld [vmem:[#allocation2 + $0x3f8] sm:$0x3]   ;;  %1627 = vst.msk [vmem:[%s2335_s1 + $0x38] sm:$0x3] %vm812_vm0, %v811_v46   ;;  %1653 = vst [vmem:[%s2335_s1 + $0x2] sm:$0x3] %v937_v59  }
  0x8c   :  { %v891_v48 = vld [vmem:[#allocation2 + $0x438] sm:$0x3]   ;;  %1642 = vst.msk [vmem:[%s2335_s1 + $0xfe] sm:$0x3] %vm812_vm0, %v886_v47   ;;  %1654 = vst [vmem:[%s2335_s1 + $0xa] sm:$0x3] %v941_v60  }
  0x8d   :  { %1643 = vst.msk [vmem:[%s2335_s1 + $0x138] sm:$0x3] %vm812_vm0, %v891_v48   ;;  %v896_v49 = vld [vmem:[#allocation2 + $0x478] sm:$0x3]   ;;  %v953_v63 = vld [vmem:[#allocation2 + $0x60] sm:$0x3]  }
  0x8e   :  { %v901_v50 = vld [vmem:[#allocation2 + $0x4b8] sm:$0x3]   ;;  %1644 = vst.msk [vmem:[%s2335_s1 + $0x13a] sm:$0x3] %vm812_vm0, %v896_v49   ;;  %1655 = vst [vmem:[%s2335_s1 + $0x12] sm:$0x3] %v945_v61  }
  0x8f   :  { %v906_v51 = vld [vmem:[#allocation2 + $0x4f8] sm:$0x3]   ;;  %1645 = vst.msk [vmem:[%s2335_s1 + $0x13c] sm:$0x3] %vm812_vm0, %v901_v50   ;;  %1657 = vst [vmem:[%s2335_s1 + $0x22] sm:$0x3] %v953_v63  }
  0x90   :  { %1646 = vst.msk [vmem:[%s2335_s1 + $0x13e] sm:$0x3] %vm812_vm0, %v906_v51   ;;  %v921_v54 = vld [vmem:[#allocation2 + $0x18] sm:$0x3]   ;;  %v957_v0 = vld [vmem:[#allocation2 + $0x68] sm:$0x3]  }
  0x91   :  { %1649 = vst [vmem:[%s2335_s1 + $0x18] sm:$0x3] %v921_v54   ;;  %v949_v62 = vld [vmem:[#allocation2 + $0x58] sm:$0x3]   ;;  %v961_v1 = vld [vmem:[#allocation2 + $0x70] sm:$0x3]  }
  0x92   :  { %1656 = vst [vmem:[%s2335_s1 + $0x1a] sm:$0x3] %v949_v62   ;;  %v965_v2 = vld [vmem:[#allocation2 + $0x80] sm:$0x3]   ;;  %1658 = vst [vmem:[%s2335_s1 + $0x2a] sm:$0x3] %v957_v0  }
  0x93   :  { %1659 = vst [vmem:[%s2335_s1 + $0x32] sm:$0x3] %v961_v1   ;;  %1660 = vst [vmem:[%s2335_s1 + $0x4] sm:$0x3] %v965_v2   ;;  %v969_v3 = vld [vmem:[#allocation2 + $0x88] sm:$0x3]  }
  0x94   :  { %v973_v4 = vld [vmem:[#allocation2 + $0x90] sm:$0x3]   ;;  %v977_v5 = vld [vmem:[#allocation2 + $0x98] sm:$0x3]   ;;  %1661 = vst [vmem:[%s2335_s1 + $0xc] sm:$0x3] %v969_v3  }
  0x95   :  { %1662 = vst [vmem:[%s2335_s1 + $0x14] sm:$0x3] %v973_v4   ;;  %1663 = vst [vmem:[%s2335_s1 + $0x1c] sm:$0x3] %v977_v5   ;;  %v981_v6 = vld [vmem:[#allocation2 + $0xa0] sm:$0x3]  }
  0x96   :  { %v985_v7 = vld [vmem:[#allocation2 + $0xa8] sm:$0x3]   ;;  %v989_v8 = vld [vmem:[#allocation2 + $0xb0] sm:$0x3]   ;;  %1664 = vst [vmem:[%s2335_s1 + $0x24] sm:$0x3] %v981_v6  }
  0x97   :  { %1665 = vst [vmem:[%s2335_s1 + $0x2c] sm:$0x3] %v985_v7   ;;  %1666 = vst [vmem:[%s2335_s1 + $0x34] sm:$0x3] %v989_v8   ;;  %v993_v9 = vld [vmem:[#allocation2 + $0xc0] sm:$0x3]  }
  0x98   :  { %v997_v10 = vld [vmem:[#allocation2 + $0xc8] sm:$0x3]   ;;  %v1001_v11 = vld [vmem:[#allocation2 + $0xd0] sm:$0x3]   ;;  %1667 = vst [vmem:[%s2335_s1 + $0x6] sm:$0x3] %v993_v9  }
  0x99   :  { %1668 = vst [vmem:[%s2335_s1 + $0xe] sm:$0x3] %v997_v10   ;;  %1669 = vst [vmem:[%s2335_s1 + $0x16] sm:$0x3] %v1001_v11   ;;  %v1005_v12 = vld [vmem:[#allocation2 + $0xd8] sm:$0x3]  }
  0x9a   :  { %v1009_v13 = vld [vmem:[#allocation2 + $0xe0] sm:$0x3]   ;;  %v1013_v14 = vld [vmem:[#allocation2 + $0xe8] sm:$0x3]   ;;  %1670 = vst [vmem:[%s2335_s1 + $0x1e] sm:$0x3] %v1005_v12  }
  0x9b   :  { %1671 = vst [vmem:[%s2335_s1 + $0x26] sm:$0x3] %v1009_v13   ;;  %1672 = vst [vmem:[%s2335_s1 + $0x2e] sm:$0x3] %v1013_v14   ;;  %v1017_v15 = vld [vmem:[#allocation2 + $0xf0] sm:$0x3]  }
  0x9c   :  { %v1021_v16 = vld [vmem:[#allocation2 + $0x100] sm:$0x3]   ;;  %v1025_v17 = vld [vmem:[#allocation2 + $0x108] sm:$0x3]   ;;  %1673 = vst [vmem:[%s2335_s1 + $0x36] sm:$0x3] %v1017_v15  }
  0x9d   :  { %1674 = vst [vmem:[%s2335_s1 + $0x40] sm:$0x3] %v1021_v16   ;;  %1675 = vst [vmem:[%s2335_s1 + $0x48] sm:$0x3] %v1025_v17   ;;  %v1029_v18 = vld [vmem:[#allocation2 + $0x110] sm:$0x3]  }
  0x9e   :  { %v1033_v19 = vld [vmem:[#allocation2 + $0x118] sm:$0x3]   ;;  %v1037_v20 = vld [vmem:[#allocation2 + $0x120] sm:$0x3]   ;;  %1676 = vst [vmem:[%s2335_s1 + $0x50] sm:$0x3] %v1029_v18  }
  0x9f   :  { %1677 = vst [vmem:[%s2335_s1 + $0x58] sm:$0x3] %v1033_v19   ;;  %1678 = vst [vmem:[%s2335_s1 + $0x60] sm:$0x3] %v1037_v20   ;;  %v1041_v21 = vld [vmem:[#allocation2 + $0x128] sm:$0x3]  }
  0xa0   :  { %v1045_v22 = vld [vmem:[#allocation2 + $0x130] sm:$0x3]   ;;  %v1049_v23 = vld [vmem:[#allocation2 + $0x140] sm:$0x3]   ;;  %1679 = vst [vmem:[%s2335_s1 + $0x68] sm:$0x3] %v1041_v21  }
  0xa1   :  { %1680 = vst [vmem:[%s2335_s1 + $0x70] sm:$0x3] %v1045_v22   ;;  %1681 = vst [vmem:[%s2335_s1 + $0x42] sm:$0x3] %v1049_v23   ;;  %v1053_v24 = vld [vmem:[#allocation2 + $0x148] sm:$0x3]  }
  0xa2   :  { %v1057_v25 = vld [vmem:[#allocation2 + $0x150] sm:$0x3]   ;;  %v1061_v26 = vld [vmem:[#allocation2 + $0x158] sm:$0x3]   ;;  %1682 = vst [vmem:[%s2335_s1 + $0x4a] sm:$0x3] %v1053_v24  }
  0xa3   :  { %1683 = vst [vmem:[%s2335_s1 + $0x52] sm:$0x3] %v1057_v25   ;;  %1684 = vst [vmem:[%s2335_s1 + $0x5a] sm:$0x3] %v1061_v26   ;;  %v1065_v27 = vld [vmem:[#allocation2 + $0x160] sm:$0x3]  }
  0xa4   :  { %v1069_v28 = vld [vmem:[#allocation2 + $0x168] sm:$0x3]   ;;  %v1073_v29 = vld [vmem:[#allocation2 + $0x170] sm:$0x3]   ;;  %1685 = vst [vmem:[%s2335_s1 + $0x62] sm:$0x3] %v1065_v27  }
  0xa5   :  { %1686 = vst [vmem:[%s2335_s1 + $0x6a] sm:$0x3] %v1069_v28   ;;  %1687 = vst [vmem:[%s2335_s1 + $0x72] sm:$0x3] %v1073_v29   ;;  %v1077_v30 = vld [vmem:[#allocation2 + $0x180] sm:$0x3]  }
  0xa6   :  { %v1081_v31 = vld [vmem:[#allocation2 + $0x188] sm:$0x3]   ;;  %v1085_v32 = vld [vmem:[#allocation2 + $0x190] sm:$0x3]   ;;  %1688 = vst [vmem:[%s2335_s1 + $0x44] sm:$0x3] %v1077_v30  }
  0xa7   :  { %1689 = vst [vmem:[%s2335_s1 + $0x4c] sm:$0x3] %v1081_v31   ;;  %1690 = vst [vmem:[%s2335_s1 + $0x54] sm:$0x3] %v1085_v32   ;;  %v1089_v33 = vld [vmem:[#allocation2 + $0x198] sm:$0x3]  }
  0xa8   :  { %v1093_v34 = vld [vmem:[#allocation2 + $0x1a0] sm:$0x3]   ;;  %v1097_v35 = vld [vmem:[#allocation2 + $0x1a8] sm:$0x3]   ;;  %1691 = vst [vmem:[%s2335_s1 + $0x5c] sm:$0x3] %v1089_v33  }
  0xa9   :  { %1692 = vst [vmem:[%s2335_s1 + $0x64] sm:$0x3] %v1093_v34   ;;  %1693 = vst [vmem:[%s2335_s1 + $0x6c] sm:$0x3] %v1097_v35   ;;  %v1101_v36 = vld [vmem:[#allocation2 + $0x1b0] sm:$0x3]  }
  0xaa   :  { %v1105_v37 = vld [vmem:[#allocation2 + $0x1c0] sm:$0x3]   ;;  %v1109_v38 = vld [vmem:[#allocation2 + $0x1c8] sm:$0x3]   ;;  %1694 = vst [vmem:[%s2335_s1 + $0x74] sm:$0x3] %v1101_v36  }
  0xab   :  { %1695 = vst [vmem:[%s2335_s1 + $0x46] sm:$0x3] %v1105_v37   ;;  %1696 = vst [vmem:[%s2335_s1 + $0x4e] sm:$0x3] %v1109_v38   ;;  %v1113_v39 = vld [vmem:[#allocation2 + $0x1d0] sm:$0x3]  }
  0xac   :  { %v1117_v40 = vld [vmem:[#allocation2 + $0x1d8] sm:$0x3]   ;;  %v1121_v41 = vld [vmem:[#allocation2 + $0x1e0] sm:$0x3]   ;;  %1697 = vst [vmem:[%s2335_s1 + $0x56] sm:$0x3] %v1113_v39  }
  0xad   :  { %1698 = vst [vmem:[%s2335_s1 + $0x5e] sm:$0x3] %v1117_v40   ;;  %1699 = vst [vmem:[%s2335_s1 + $0x66] sm:$0x3] %v1121_v41   ;;  %v1125_v42 = vld [vmem:[#allocation2 + $0x1e8] sm:$0x3]  }
  0xae   :  { %v1129_v43 = vld [vmem:[#allocation2 + $0x1f0] sm:$0x3]   ;;  %v1133_v44 = vld [vmem:[#allocation2 + $0x200] sm:$0x3]   ;;  %1700 = vst [vmem:[%s2335_s1 + $0x6e] sm:$0x3] %v1125_v42  }
  0xaf   :  { %1701 = vst [vmem:[%s2335_s1 + $0x76] sm:$0x3] %v1129_v43   ;;  %1702 = vst [vmem:[%s2335_s1 + $0x80] sm:$0x3] %v1133_v44   ;;  %v1137_v45 = vld [vmem:[#allocation2 + $0x208] sm:$0x3]  }
  0xb0   :  { %v1141_v46 = vld [vmem:[#allocation2 + $0x210] sm:$0x3]   ;;  %v1145_v47 = vld [vmem:[#allocation2 + $0x218] sm:$0x3]   ;;  %1703 = vst [vmem:[%s2335_s1 + $0x88] sm:$0x3] %v1137_v45  }
  0xb1   :  { %1704 = vst [vmem:[%s2335_s1 + $0x90] sm:$0x3] %v1141_v46   ;;  %1705 = vst [vmem:[%s2335_s1 + $0x98] sm:$0x3] %v1145_v47   ;;  %v1149_v48 = vld [vmem:[#allocation2 + $0x220] sm:$0x3]  }
  0xb2   :  { %v1153_v49 = vld [vmem:[#allocation2 + $0x228] sm:$0x3]   ;;  %v1157_v50 = vld [vmem:[#allocation2 + $0x230] sm:$0x3]   ;;  %1706 = vst [vmem:[%s2335_s1 + $0xa0] sm:$0x3] %v1149_v48  }
  0xb3   :  { %1707 = vst [vmem:[%s2335_s1 + $0xa8] sm:$0x3] %v1153_v49   ;;  %1708 = vst [vmem:[%s2335_s1 + $0xb0] sm:$0x3] %v1157_v50   ;;  %v1161_v51 = vld [vmem:[#allocation2 + $0x240] sm:$0x3]  }
  0xb4   :  { %v1165_v52 = vld [vmem:[#allocation2 + $0x248] sm:$0x3]   ;;  %v1169_v53 = vld [vmem:[#allocation2 + $0x250] sm:$0x3]   ;;  %1709 = vst [vmem:[%s2335_s1 + $0x82] sm:$0x3] %v1161_v51  }
  0xb5   :  { %1710 = vst [vmem:[%s2335_s1 + $0x8a] sm:$0x3] %v1165_v52   ;;  %1711 = vst [vmem:[%s2335_s1 + $0x92] sm:$0x3] %v1169_v53   ;;  %v1173_v54 = vld [vmem:[#allocation2 + $0x258] sm:$0x3]  }
  0xb6   :  { %v1177_v55 = vld [vmem:[#allocation2 + $0x260] sm:$0x3]   ;;  %v1181_v56 = vld [vmem:[#allocation2 + $0x268] sm:$0x3]   ;;  %1712 = vst [vmem:[%s2335_s1 + $0x9a] sm:$0x3] %v1173_v54  }
  0xb7   :  { %1713 = vst [vmem:[%s2335_s1 + $0xa2] sm:$0x3] %v1177_v55   ;;  %1714 = vst [vmem:[%s2335_s1 + $0xaa] sm:$0x3] %v1181_v56   ;;  %v1185_v57 = vld [vmem:[#allocation2 + $0x270] sm:$0x3]  }
  0xb8   :  { %v1189_v58 = vld [vmem:[#allocation2 + $0x280] sm:$0x3]   ;;  %v1193_v59 = vld [vmem:[#allocation2 + $0x288] sm:$0x3]   ;;  %1715 = vst [vmem:[%s2335_s1 + $0xb2] sm:$0x3] %v1185_v57  }
  0xb9   :  { %1716 = vst [vmem:[%s2335_s1 + $0x84] sm:$0x3] %v1189_v58   ;;  %1717 = vst [vmem:[%s2335_s1 + $0x8c] sm:$0x3] %v1193_v59   ;;  %v1197_v60 = vld [vmem:[#allocation2 + $0x290] sm:$0x3]  }
  0xba   :  { %v1201_v61 = vld [vmem:[#allocation2 + $0x298] sm:$0x3]   ;;  %v1205_v62 = vld [vmem:[#allocation2 + $0x2a0] sm:$0x3]   ;;  %1718 = vst [vmem:[%s2335_s1 + $0x94] sm:$0x3] %v1197_v60  }
  0xbb   :  { %1719 = vst [vmem:[%s2335_s1 + $0x9c] sm:$0x3] %v1201_v61   ;;  %1720 = vst [vmem:[%s2335_s1 + $0xa4] sm:$0x3] %v1205_v62   ;;  %v1209_v63 = vld [vmem:[#allocation2 + $0x2a8] sm:$0x3]  }
  0xbc   :  { %v1213_v0 = vld [vmem:[#allocation2 + $0x2b0] sm:$0x3]   ;;  %v1217_v1 = vld [vmem:[#allocation2 + $0x2c0] sm:$0x3]   ;;  %1721 = vst [vmem:[%s2335_s1 + $0xac] sm:$0x3] %v1209_v63  }
  0xbd   :  { %1722 = vst [vmem:[%s2335_s1 + $0xb4] sm:$0x3] %v1213_v0   ;;  %1723 = vst [vmem:[%s2335_s1 + $0x86] sm:$0x3] %v1217_v1   ;;  %v1221_v2 = vld [vmem:[#allocation2 + $0x2c8] sm:$0x3]  }
  0xbe   :  { %v1225_v3 = vld [vmem:[#allocation2 + $0x2d0] sm:$0x3]   ;;  %v1229_v4 = vld [vmem:[#allocation2 + $0x2d8] sm:$0x3]   ;;  %1724 = vst [vmem:[%s2335_s1 + $0x8e] sm:$0x3] %v1221_v2  }
  0xbf   :  { %1725 = vst [vmem:[%s2335_s1 + $0x96] sm:$0x3] %v1225_v3   ;;  %1726 = vst [vmem:[%s2335_s1 + $0x9e] sm:$0x3] %v1229_v4   ;;  %v1233_v5 = vld [vmem:[#allocation2 + $0x2e0] sm:$0x3]  }
  0xc0   :  { %v1237_v6 = vld [vmem:[#allocation2 + $0x2e8] sm:$0x3]   ;;  %v1241_v7 = vld [vmem:[#allocation2 + $0x2f0] sm:$0x3]   ;;  %1727 = vst [vmem:[%s2335_s1 + $0xa6] sm:$0x3] %v1233_v5  }
  0xc1   :  { %1728 = vst [vmem:[%s2335_s1 + $0xae] sm:$0x3] %v1237_v6   ;;  %1729 = vst [vmem:[%s2335_s1 + $0xb6] sm:$0x3] %v1241_v7   ;;  %v1245_v8 = vld [vmem:[#allocation2 + $0x300] sm:$0x3]  }
  0xc2   :  { %v1249_v9 = vld [vmem:[#allocation2 + $0x308] sm:$0x3]   ;;  %v1253_v10 = vld [vmem:[#allocation2 + $0x310] sm:$0x3]   ;;  %1730 = vst [vmem:[%s2335_s1 + $0xc0] sm:$0x3] %v1245_v8  }
  0xc3   :  { %1731 = vst [vmem:[%s2335_s1 + $0xc8] sm:$0x3] %v1249_v9   ;;  %1732 = vst [vmem:[%s2335_s1 + $0xd0] sm:$0x3] %v1253_v10   ;;  %v1257_v11 = vld [vmem:[#allocation2 + $0x318] sm:$0x3]  }
  0xc4   :  { %v1261_v12 = vld [vmem:[#allocation2 + $0x320] sm:$0x3]   ;;  %v1265_v13 = vld [vmem:[#allocation2 + $0x328] sm:$0x3]   ;;  %1733 = vst [vmem:[%s2335_s1 + $0xd8] sm:$0x3] %v1257_v11  }
  0xc5   :  { %1734 = vst [vmem:[%s2335_s1 + $0xe0] sm:$0x3] %v1261_v12   ;;  %1735 = vst [vmem:[%s2335_s1 + $0xe8] sm:$0x3] %v1265_v13   ;;  %v1269_v14 = vld [vmem:[#allocation2 + $0x330] sm:$0x3]  }
  0xc6   :  { %v1273_v15 = vld [vmem:[#allocation2 + $0x340] sm:$0x3]   ;;  %v1277_v16 = vld [vmem:[#allocation2 + $0x348] sm:$0x3]   ;;  %1736 = vst [vmem:[%s2335_s1 + $0xf0] sm:$0x3] %v1269_v14  }
  0xc7   :  { %1737 = vst [vmem:[%s2335_s1 + $0xc2] sm:$0x3] %v1273_v15   ;;  %1738 = vst [vmem:[%s2335_s1 + $0xca] sm:$0x3] %v1277_v16   ;;  %v1281_v17 = vld [vmem:[#allocation2 + $0x350] sm:$0x3]  }
  0xc8   :  { %v1285_v18 = vld [vmem:[#allocation2 + $0x358] sm:$0x3]   ;;  %v1289_v19 = vld [vmem:[#allocation2 + $0x360] sm:$0x3]   ;;  %1739 = vst [vmem:[%s2335_s1 + $0xd2] sm:$0x3] %v1281_v17  }
  0xc9   :  { %1740 = vst [vmem:[%s2335_s1 + $0xda] sm:$0x3] %v1285_v18   ;;  %1741 = vst [vmem:[%s2335_s1 + $0xe2] sm:$0x3] %v1289_v19   ;;  %v1293_v20 = vld [vmem:[#allocation2 + $0x368] sm:$0x3]  }
  0xca   :  { %v1297_v21 = vld [vmem:[#allocation2 + $0x370] sm:$0x3]   ;;  %v1301_v22 = vld [vmem:[#allocation2 + $0x380] sm:$0x3]   ;;  %1742 = vst [vmem:[%s2335_s1 + $0xea] sm:$0x3] %v1293_v20  }
  0xcb   :  { %1743 = vst [vmem:[%s2335_s1 + $0xf2] sm:$0x3] %v1297_v21   ;;  %1744 = vst [vmem:[%s2335_s1 + $0xc4] sm:$0x3] %v1301_v22   ;;  %v1305_v23 = vld [vmem:[#allocation2 + $0x388] sm:$0x3]  }
  0xcc   :  { %v1309_v24 = vld [vmem:[#allocation2 + $0x390] sm:$0x3]   ;;  %v1313_v25 = vld [vmem:[#allocation2 + $0x398] sm:$0x3]   ;;  %1745 = vst [vmem:[%s2335_s1 + $0xcc] sm:$0x3] %v1305_v23  }
  0xcd   :  { %1746 = vst [vmem:[%s2335_s1 + $0xd4] sm:$0x3] %v1309_v24   ;;  %1747 = vst [vmem:[%s2335_s1 + $0xdc] sm:$0x3] %v1313_v25   ;;  %v1317_v26 = vld [vmem:[#allocation2 + $0x3a0] sm:$0x3]  }
  0xce   :  { %v1321_v27 = vld [vmem:[#allocation2 + $0x3a8] sm:$0x3]   ;;  %v1325_v28 = vld [vmem:[#allocation2 + $0x3b0] sm:$0x3]   ;;  %1748 = vst [vmem:[%s2335_s1 + $0xe4] sm:$0x3] %v1317_v26  }
  0xcf   :  { %1749 = vst [vmem:[%s2335_s1 + $0xec] sm:$0x3] %v1321_v27   ;;  %1750 = vst [vmem:[%s2335_s1 + $0xf4] sm:$0x3] %v1325_v28   ;;  %v1329_v29 = vld [vmem:[#allocation2 + $0x3c0] sm:$0x3]  }
  0xd0   :  { %v1333_v30 = vld [vmem:[#allocation2 + $0x3c8] sm:$0x3]   ;;  %v1337_v31 = vld [vmem:[#allocation2 + $0x3d0] sm:$0x3]   ;;  %1751 = vst [vmem:[%s2335_s1 + $0xc6] sm:$0x3] %v1329_v29  }
  0xd1   :  { %1752 = vst [vmem:[%s2335_s1 + $0xce] sm:$0x3] %v1333_v30   ;;  %1753 = vst [vmem:[%s2335_s1 + $0xd6] sm:$0x3] %v1337_v31   ;;  %v1341_v32 = vld [vmem:[#allocation2 + $0x3d8] sm:$0x3]  }
  0xd2   :  { %v1345_v33 = vld [vmem:[#allocation2 + $0x3e0] sm:$0x3]   ;;  %v1349_v34 = vld [vmem:[#allocation2 + $0x3e8] sm:$0x3]   ;;  %1754 = vst [vmem:[%s2335_s1 + $0xde] sm:$0x3] %v1341_v32  }
  0xd3   :  { %1755 = vst [vmem:[%s2335_s1 + $0xe6] sm:$0x3] %v1345_v33   ;;  %1756 = vst [vmem:[%s2335_s1 + $0xee] sm:$0x3] %v1349_v34   ;;  %v1353_v35 = vld [vmem:[#allocation2 + $0x3f0] sm:$0x3]  }
  0xd4   :  { %v1357_v36 = vld [vmem:[#allocation2 + $0x400] sm:$0x3]   ;;  %v1361_v37 = vld [vmem:[#allocation2 + $0x408] sm:$0x3]   ;;  %1757 = vst [vmem:[%s2335_s1 + $0xf6] sm:$0x3] %v1353_v35  }
  0xd5   :  { %1758 = vst [vmem:[%s2335_s1 + $0x100] sm:$0x3] %v1357_v36   ;;  %1759 = vst [vmem:[%s2335_s1 + $0x108] sm:$0x3] %v1361_v37   ;;  %v1365_v38 = vld [vmem:[#allocation2 + $0x410] sm:$0x3]  }
  0xd6   :  { %v1369_v39 = vld [vmem:[#allocation2 + $0x418] sm:$0x3]   ;;  %v1373_v40 = vld [vmem:[#allocation2 + $0x420] sm:$0x3]   ;;  %1760 = vst [vmem:[%s2335_s1 + $0x110] sm:$0x3] %v1365_v38  }
  0xd7   :  { %1761 = vst [vmem:[%s2335_s1 + $0x118] sm:$0x3] %v1369_v39   ;;  %1762 = vst [vmem:[%s2335_s1 + $0x120] sm:$0x3] %v1373_v40   ;;  %v1377_v41 = vld [vmem:[#allocation2 + $0x428] sm:$0x3]  }
  0xd8   :  { %v1381_v42 = vld [vmem:[#allocation2 + $0x430] sm:$0x3]   ;;  %v1385_v43 = vld [vmem:[#allocation2 + $0x440] sm:$0x3]   ;;  %1763 = vst [vmem:[%s2335_s1 + $0x128] sm:$0x3] %v1377_v41  }
  0xd9   :  { %1764 = vst [vmem:[%s2335_s1 + $0x130] sm:$0x3] %v1381_v42   ;;  %1765 = vst [vmem:[%s2335_s1 + $0x102] sm:$0x3] %v1385_v43   ;;  %v1389_v44 = vld [vmem:[#allocation2 + $0x448] sm:$0x3]  }
  0xda   :  { %v1393_v45 = vld [vmem:[#allocation2 + $0x450] sm:$0x3]   ;;  %v1397_v46 = vld [vmem:[#allocation2 + $0x458] sm:$0x3]   ;;  %1766 = vst [vmem:[%s2335_s1 + $0x10a] sm:$0x3] %v1389_v44  }
  0xdb   :  { %1767 = vst [vmem:[%s2335_s1 + $0x112] sm:$0x3] %v1393_v45   ;;  %1768 = vst [vmem:[%s2335_s1 + $0x11a] sm:$0x3] %v1397_v46   ;;  %v1401_v47 = vld [vmem:[#allocation2 + $0x460] sm:$0x3]  }
  0xdc   :  { %v1405_v48 = vld [vmem:[#allocation2 + $0x468] sm:$0x3]   ;;  %v1409_v49 = vld [vmem:[#allocation2 + $0x470] sm:$0x3]   ;;  %1769 = vst [vmem:[%s2335_s1 + $0x122] sm:$0x3] %v1401_v47  }
  0xdd   :  { %1770 = vst [vmem:[%s2335_s1 + $0x12a] sm:$0x3] %v1405_v48   ;;  %1771 = vst [vmem:[%s2335_s1 + $0x132] sm:$0x3] %v1409_v49   ;;  %v1413_v50 = vld [vmem:[#allocation2 + $0x480] sm:$0x3]  }
  0xde   :  { %v1417_v51 = vld [vmem:[#allocation2 + $0x488] sm:$0x3]   ;;  %v1421_v52 = vld [vmem:[#allocation2 + $0x490] sm:$0x3]   ;;  %1772 = vst [vmem:[%s2335_s1 + $0x104] sm:$0x3] %v1413_v50  }
  0xdf   :  { %1773 = vst [vmem:[%s2335_s1 + $0x10c] sm:$0x3] %v1417_v51   ;;  %1774 = vst [vmem:[%s2335_s1 + $0x114] sm:$0x3] %v1421_v52   ;;  %v1425_v53 = vld [vmem:[#allocation2 + $0x498] sm:$0x3]  }
  0xe0   :  { %v1429_v54 = vld [vmem:[#allocation2 + $0x4a0] sm:$0x3]   ;;  %v1433_v55 = vld [vmem:[#allocation2 + $0x4a8] sm:$0x3]   ;;  %1775 = vst [vmem:[%s2335_s1 + $0x11c] sm:$0x3] %v1425_v53  }
  0xe1   :  { %1776 = vst [vmem:[%s2335_s1 + $0x124] sm:$0x3] %v1429_v54   ;;  %1777 = vst [vmem:[%s2335_s1 + $0x12c] sm:$0x3] %v1433_v55   ;;  %v1437_v56 = vld [vmem:[#allocation2 + $0x4b0] sm:$0x3]  }
  0xe2   :  { %v1441_v57 = vld [vmem:[#allocation2 + $0x4c0] sm:$0x3]   ;;  %v1445_v58 = vld [vmem:[#allocation2 + $0x4c8] sm:$0x3]   ;;  %1778 = vst [vmem:[%s2335_s1 + $0x134] sm:$0x3] %v1437_v56  }
  0xe3   :  { %1779 = vst [vmem:[%s2335_s1 + $0x106] sm:$0x3] %v1441_v57   ;;  %1780 = vst [vmem:[%s2335_s1 + $0x10e] sm:$0x3] %v1445_v58   ;;  %v1449_v59 = vld [vmem:[#allocation2 + $0x4d0] sm:$0x3]  }
  0xe4   :  { %v1453_v60 = vld [vmem:[#allocation2 + $0x4d8] sm:$0x3]   ;;  %v1457_v61 = vld [vmem:[#allocation2 + $0x4e0] sm:$0x3]   ;;  %1781 = vst [vmem:[%s2335_s1 + $0x116] sm:$0x3] %v1449_v59  }
  0xe5   :  { %1782 = vst [vmem:[%s2335_s1 + $0x11e] sm:$0x3] %v1453_v60   ;;  %1783 = vst [vmem:[%s2335_s1 + $0x126] sm:$0x3] %v1457_v61   ;;  %v1461_v62 = vld [vmem:[#allocation2 + $0x4e8] sm:$0x3]  }
  0xe6   :  { %v1465_v63 = vld [vmem:[#allocation2 + $0x4f0] sm:$0x3]   ;;  %1784 = vst [vmem:[%s2335_s1 + $0x12e] sm:$0x3] %v1461_v62  }
  0xe7   :  { %1785 = vst [vmem:[%s2335_s1 + $0x136] sm:$0x3] %v1465_v63  }
  0xe8   :  { %1468 = vsyncpa [#allocation1], 1 }

// kernel: net1_forward.1
= control target key start
LH: loop header
LB: loop body
LE: loop exit
PB: predicated region body
PF: predicated region fallthrough
CT: control target
= control target key end

     0   :  { %s498_s14 = smov 0   ;;  %s621_s0 = inlined_call_operand.<no memory space> [shape: f32[1], index: 0, kind: input, shape index: {}]   ;;  %s622_s1 = inlined_call_operand.vmem [shape: f32[1,640], index: 1, kind: input, shape index: {}]   ;;  %s623_s2 = inlined_call_operand.vmem [shape: f32[64,640], index: 2, kind: input, shape index: {}]   ;;  %s624_s3 = inlined_call_operand.vmem [shape: f32[64,640], index: 3, kind: output, shape index: {}]  }
   0x1   :  { %8 = sst [smem:[#allocation2]] %s621_s0 }
   0x2 LB: > { %s407_s15 = sadd.s32 4294967295, %s473_s14   ;;  %p411_p0 = scmp.ge.s32.totalorder %s473_s14, 1  ;;  %s473_s14 = sphi %s498_s14, %s14_s14  }
   0x3   : > { %p140_p1 = scmp.lt.s32.totalorder %s473_s14, 3 }
   0x5   : > { %p141_p2 = pnand %p411_p0, %p140_p1 }
   0x6   : > { %s412_s16 = sshll.u32 (!%p141_p2), %s407_s15, 2  ;;  %s181_s17 = sld [smem:[#allocation2]] (!%p141_p2)  ;;  %v224_v0 = vlaneseq (!%p141_p2)  ;;  %v180_v2 = vld [vmem:[%s622_s1] sm:$0x1f] (!%p141_p2) }
   0x7   : > { %144 = sbr.rel (%p141_p2) target bundleno = 58 (0x3a), region = 32  ;;  %p167_p3 = scmp.lt.s32.totalorder (!%p141_p2), %s412_s16, 7 }
   0x8   : > { %v225_v1 = vshrl.u32 (!%p141_p2), %v224_v0, 7 }
   0xa   : > { %v226_v3 = vsub.s32 (!%p141_p2), 0, %v225_v1  ;;  %v230_v4 = vsub.s32 (!%p141_p2), 1, %v225_v1  ;;  %v234_v5 = vsub.s32 (!%p141_p2), 2, %v225_v1  ;;  %v238_v6 = vsub.s32 (!%p141_p2), 3, %v225_v1 }
   0xb   : > { %v242_v7 = vsub.s32 (!%p141_p2), 4, %v225_v1 }
   0xc   : > { %v512_v8 = vstv (!%p141_p2), %s181_s17  ;;  %v521_v9 = vrot.slane (!%p141_p2), %v180_v2, %v226_v3  ;;  %v523_v10 = vrot.slane (!%p141_p2), %v180_v2, %v230_v4  ;;  %v525_v11 = vrot.slane (!%p141_p2), %v180_v2, %v234_v5 }
   0xd   : > { %v530_v15 = vrot.slane (!%p141_p2), %v180_v2, %v238_v6  ;;  %v537_v21 = vrot.slane (!%p141_p2), %v180_v2, %v242_v7 }
   0xe   : > { %s626_s16 = smov (!%p167_p3, %s412_s16), 7 }
   0xf   : > { %s418_s19 = smul.u32 40, %s626_s16 }
  0x11   : > { %s519_s22 = scalar_lea.vmem %s623_s2, %s418_s19  ;;  %s592_s25 = scalar_lea.vmem %s624_s3, %s418_s19 }
  0x12   : > { %v182_v12 = vld [vmem:[%s519_s22] sm:$0xff]  ;;  %v183_v13 = vld [vmem:[%s519_s22 + $0x8] sm:$0xff]  ;;  %v184_v14 = vld [vmem:[%s519_s22 + $0x10] sm:$0xff] }
  0x13   : > { %v203_v16 = vmul.f32 %v512_v8, %v182_v12  ;;  %v204_v17 = vmul.f32 %v512_v8, %v183_v13  ;;  %v205_v18 = vmul.f32 %v512_v8, %v184_v14  ;;  %v185_v19 = vld [vmem:[%s519_s22 + $0x18] sm:$0xff]  ;;  %v186_v20 = vld [vmem:[%s519_s22 + $0x20] sm:$0xff]  ;;  %v187_v22 = vld [vmem:[%s519_s22 + $0x28] sm:$0xff] }
  0x14   : > { %v206_v23 = vmul.f32 %v512_v8, %v185_v19  ;;  %v207_v24 = vmul.f32 %v512_v8, %v186_v20  ;;  %v208_v25 = vmul.f32 %v512_v8, %v187_v22  ;;  %v188_v26 = vld [vmem:[%s519_s22 + $0x30] sm:$0xff]  ;;  %v189_v27 = vld [vmem:[%s519_s22 + $0x38] sm:$0xff]  ;;  %v190_v28 = vld [vmem:[%s519_s22 + $0x40] sm:$0xff] }
  0x15   : > { %v249_v29 = vadd.f32 %v521_v9, %v203_v16  ;;  %v250_v30 = vadd.f32 %v523_v10, %v204_v17  ;;  %v251_v31 = vadd.f32 %v525_v11, %v205_v18  ;;  %v209_v32 = vmul.f32 %v512_v8, %v188_v26  ;;  %v191_v33 = vld [vmem:[%s519_s22 + $0x48] sm:$0xff]  ;;  %v192_v36 = vld [vmem:[%s519_s22 + $0x50] sm:$0xff]  ;;  %v193_v39 = vld [vmem:[%s519_s22 + $0x58] sm:$0xff] }
  0x16   : > { %v252_v34 = vadd.f32 %v530_v15, %v206_v23  ;;  %v210_v35 = vmul.f32 %v512_v8, %v189_v27  ;;  %v253_v37 = vadd.f32 %v537_v21, %v207_v24  ;;  %v211_v38 = vmul.f32 %v512_v8, %v190_v28  ;;  %v194_v42 = vld [vmem:[%s519_s22 + $0x60] sm:$0xff]  ;;  %v195_v45 = vld [vmem:[%s519_s22 + $0x68] sm:$0xff]  ;;  %v196_v48 = vld [vmem:[%s519_s22 + $0x70] sm:$0xff] }
  0x17   : > { %427 = vtanh.f32 %v249_v29  ;;  %v254_v40 = vadd.f32 %v521_v9, %v208_v25  ;;  %v212_v41 = vmul.f32 %v512_v8, %v191_v33  ;;  %v255_v43 = vadd.f32 %v523_v10, %v209_v32  ;;  %v197_v51 = vld [vmem:[%s519_s22 + $0x78] sm:$0xff]  ;;  %v198_v54 = vld [vmem:[%s519_s22 + $0x80] sm:$0xff]  ;;  %v199_v57 = vld [vmem:[%s519_s22 + $0x88] sm:$0xff] }
  0x18   : > { %429 = vtanh.f32 %v250_v30  ;;  %v213_v44 = vmul.f32 %v512_v8, %v192_v36  ;;  %v256_v46 = vadd.f32 %v525_v11, %v210_v35  ;;  %v214_v47 = vmul.f32 %v512_v8, %v193_v39  ;;  %v200_v60 = vld [vmem:[%s519_s22 + $0x90] sm:$0xff]  ;;  %v201_v63 = vld [vmem:[%s519_s22 + $0x98] sm:$0xff] }
  0x19   : > { %431 = vtanh.f32 %v251_v31  ;;  %v257_v49 = vadd.f32 %v530_v15, %v211_v38  ;;  %v215_v50 = vmul.f32 %v512_v8, %v194_v42  ;;  %v258_v52 = vadd.f32 %v537_v21, %v212_v41 }
  0x1a   : > { %433 = vtanh.f32 %v252_v34  ;;  %v216_v53 = vmul.f32 %v512_v8, %v195_v45  ;;  %v259_v55 = vadd.f32 %v521_v9, %v213_v44  ;;  %v217_v56 = vmul.f32 %v512_v8, %v196_v48 }
  0x1b   : > { %435 = vtanh.f32 %v253_v37  ;;  %v260_v58 = vadd.f32 %v523_v10, %v214_v47  ;;  %v218_v59 = vmul.f32 %v512_v8, %v197_v51  ;;  %v261_v61 = vadd.f32 %v525_v11, %v215_v50 }
  0x1c   : > { %437 = vtanh.f32 %v254_v40  ;;  %v219_v62 = vmul.f32 %v512_v8, %v198_v54  ;;  %v262_v0 = vadd.f32 %v530_v15, %v216_v53  ;;  %v220_v1 = vmul.f32 %v512_v8, %v199_v57 }
  0x1d   : > { %439 = vtanh.f32 %v255_v43  ;;  %v263_v3 = vadd.f32 %v537_v21, %v217_v56  ;;  %v221_v4 = vmul.f32 %v512_v8, %v200_v60  ;;  %v264_v7 = vadd.f32 %v521_v9, %v218_v59 }
  0x1e   : > { %441 = vtanh.f32 %v256_v46  ;;  %v222_v12 = vmul.f32 %v512_v8, %v201_v63  ;;  %v265_v16 = vadd.f32 %v523_v10, %v219_v62  ;;  %v266_v9 = vadd.f32 %v525_v11, %v220_v1 }
  0x1f   : > { %443 = vtanh.f32 %v257_v49  ;;  %v267_v23 = vadd.f32 %v530_v15, %v221_v4 }
  0x20   : > { %445 = vtanh.f32 %v258_v52  ;;  %v268_v10 = vadd.f32 %v537_v21, %v222_v12 }
  0x21   : > { %v428_v2 = vpop.eup %427  ;;  %447 = vtanh.f32 %v259_v55 }
  0x22   : > { %v430_v5 = vpop.eup %429  ;;  %v289_v6 = vmul.f32 0.5, %v428_v2  ;;  %449 = vtanh.f32 %v260_v58 }
  0x23   : > { %v432_v13 = vpop.eup %431  ;;  %v290_v14 = vmul.f32 0.5, %v430_v5  ;;  %451 = vtanh.f32 %v261_v61 }
  0x24   : > { %v434_v17 = vpop.eup %433  ;;  %v309_v18 = vadd.f32 0.5, %v289_v6  ;;  %v291_v19 = vmul.f32 0.5, %v432_v13  ;;  %453 = vtanh.f32 %v262_v0 }
  0x25   : > { %v436_v8 = vpop.eup %435  ;;  %v310_v20 = vadd.f32 0.5, %v290_v14  ;;  %v292_v22 = vmul.f32 0.5, %v434_v17  ;;  %455 = vtanh.f32 %v263_v3 }
  0x26   : > { %v438_v24 = vpop.eup %437  ;;  %329 = vst [vmem:[%s592_s25] sm:$0xff] %v309_v18  ;;  %v311_v25 = vadd.f32 0.5, %v291_v19  ;;  %v293_v26 = vmul.f32 0.5, %v436_v8  ;;  %457 = vtanh.f32 %v264_v7 }
  0x27   : > { %v440_v27 = vpop.eup %439  ;;  %330 = vst [vmem:[%s592_s25 + $0x8] sm:$0xff] %v310_v20  ;;  %v312_v28 = vadd.f32 0.5, %v292_v22  ;;  %v294_v11 = vmul.f32 0.5, %v438_v24  ;;  %459 = vtanh.f32 %v265_v16 }
  0x28   : > { %v442_v29 = vpop.eup %441  ;;  %331 = vst [vmem:[%s592_s25 + $0x10] sm:$0xff] %v311_v25  ;;  %v313_v30 = vadd.f32 0.5, %v293_v26  ;;  %v295_v31 = vmul.f32 0.5, %v440_v27  ;;  %461 = vtanh.f32 %v266_v9 }
  0x29   : > { %v444_v15 = vpop.eup %443  ;;  %332 = vst [vmem:[%s592_s25 + $0x18] sm:$0xff] %v312_v28  ;;  %v314_v32 = vadd.f32 0.5, %v294_v11  ;;  %v296_v33 = vmul.f32 0.5, %v442_v29  ;;  %463 = vtanh.f32 %v267_v23 }
  0x2a   : > { %v446_v21 = vpop.eup %445  ;;  %333 = vst [vmem:[%s592_s25 + $0x20] sm:$0xff] %v313_v30  ;;  %v315_v34 = vadd.f32 0.5, %v295_v31  ;;  %v297_v35 = vmul.f32 0.5, %v444_v15  ;;  %465 = vtanh.f32 %v268_v10 }
  0x2b   : > { %v448_v36 = vpop.eup %447  ;;  %334 = vst [vmem:[%s592_s25 + $0x28] sm:$0xff] %v314_v32  ;;  %v316_v37 = vadd.f32 0.5, %v296_v33  ;;  %v298_v38 = vmul.f32 0.5, %v446_v21 }
  0x2c   : > { %v450_v39 = vpop.eup %449  ;;  %335 = vst [vmem:[%s592_s25 + $0x30] sm:$0xff] %v315_v34  ;;  %v317_v40 = vadd.f32 0.5, %v297_v35  ;;  %v299_v41 = vmul.f32 0.5, %v448_v36 }
  0x2d   : > { %v452_v42 = vpop.eup %451  ;;  %336 = vst [vmem:[%s592_s25 + $0x38] sm:$0xff] %v316_v37  ;;  %v318_v43 = vadd.f32 0.5, %v298_v38  ;;  %v300_v44 = vmul.f32 0.5, %v450_v39 }
  0x2e   : > { %v454_v45 = vpop.eup %453  ;;  %337 = vst [vmem:[%s592_s25 + $0x40] sm:$0xff] %v317_v40  ;;  %v319_v46 = vadd.f32 0.5, %v299_v41  ;;  %v301_v47 = vmul.f32 0.5, %v452_v42 }
  0x2f   : > { %v456_v48 = vpop.eup %455  ;;  %338 = vst [vmem:[%s592_s25 + $0x48] sm:$0xff] %v318_v43  ;;  %v320_v49 = vadd.f32 0.5, %v300_v44  ;;  %v302_v50 = vmul.f32 0.5, %v454_v45 }
  0x30   : > { %v458_v51 = vpop.eup %457  ;;  %339 = vst [vmem:[%s592_s25 + $0x50] sm:$0xff] %v319_v46  ;;  %v321_v52 = vadd.f32 0.5, %v301_v47  ;;  %v303_v53 = vmul.f32 0.5, %v456_v48 }
  0x31   : > { %v460_v54 = vpop.eup %459  ;;  %340 = vst [vmem:[%s592_s25 + $0x58] sm:$0xff] %v320_v49  ;;  %v322_v55 = vadd.f32 0.5, %v302_v50  ;;  %v304_v56 = vmul.f32 0.5, %v458_v51 }
  0x32   : > { %v462_v57 = vpop.eup %461  ;;  %341 = vst [vmem:[%s592_s25 + $0x60] sm:$0xff] %v321_v52  ;;  %v323_v58 = vadd.f32 0.5, %v303_v53  ;;  %v305_v59 = vmul.f32 0.5, %v460_v54 }
  0x33   : > { %v464_v60 = vpop.eup %463  ;;  %342 = vst [vmem:[%s592_s25 + $0x68] sm:$0xff] %v322_v55  ;;  %v324_v61 = vadd.f32 0.5, %v304_v56  ;;  %v306_v62 = vmul.f32 0.5, %v462_v57 }
  0x34   : > { %v466_v63 = vpop.eup %465  ;;  %343 = vst [vmem:[%s592_s25 + $0x70] sm:$0xff] %v323_v58  ;;  %v325_v0 = vadd.f32 0.5, %v305_v59  ;;  %v307_v1 = vmul.f32 0.5, %v464_v60 }
  0x35   : > { %344 = vst [vmem:[%s592_s25 + $0x78] sm:$0xff] %v324_v61  ;;  %v326_v2 = vadd.f32 0.5, %v306_v62  ;;  %v308_v3 = vmul.f32 0.5, %v466_v63 }
  0x36   : > { %345 = vst [vmem:[%s592_s25 + $0x80] sm:$0xff] %v325_v0  ;;  %v327_v4 = vadd.f32 0.5, %v307_v1 }
  0x37   : > { %346 = vst [vmem:[%s592_s25 + $0x88] sm:$0xff] %v326_v2  ;;  %v328_v5 = vadd.f32 0.5, %v308_v3 }
  0x38   : > { %347 = vst [vmem:[%s592_s25 + $0x90] sm:$0xff] %v327_v4 }
  0x39   : > { %348 = vst [vmem:[%s592_s25 + $0x98] sm:$0xff] %v328_v5 }
  0x3a PF: > { %s14_s14 = sadd.s32 1, %s473_s14  }
  0x3b   : > { %p11_p4 = scmp.ge.s32.totalorder %s14_s14, 4  }
  0x3d   :  { %13 = sbr.rel (!%p11_p4) target bundleno = 2 (0x2), region = 62 }

</bundles_post_ra>
